<compile_context>
chip_gen: v7x
topology: tpu7x:2x2x1
jax: 0.10.0
libtpu: 0.0.40
codegen_flags: <defaults>
</compile_context>

<pallas_src>
import numpy as np
import jax
import jax.numpy as jnp
from jax import lax
from jax.experimental import pallas as pl
from jax.experimental.pallas import tpu as pltpu

# norse LIFParameters / LIParameters defaults with v_th = 0.5, dt = 0.001.
DT = 0.001
TAU_SYN_INV = 200.0          # 1 / 5e-3
TAU_MEM_INV = 100.0          # 1 / 1e-2
V_LEAK = 0.0                 # module default; strength reduction assumes 0
V_TH = 0.5
V_RESET = 0.0                # module default; strength reduction assumes 0

MEM_DECAY = 1.0 - DT * TAU_MEM_INV    # 0.9
DT_TAU_MEM = DT * TAU_MEM_INV         # 0.1
SYN_DECAY = 1.0 - DT * TAU_SYN_INV    # 0.8

UNROLL = 8                   # inner-loop unroll factor (LLO visibility)
TIME_BLOCK = 512             # upper bound on time steps per grid iteration


def _round_up(a, m):
    return ((a + m - 1) // m) * m


def _derive_time_block(T, B_pad, H, O, requested=TIME_BLOCK):
    """Largest time block whose double-buffered in/out slabs fit a conservative
    VMEM budget (kept well under the v7x 32 MiB scoped default), rounded to a
    multiple of UNROLL."""
    budget = 16 * 1024 * 1024
    bytes_per_step = 2 * (B_pad * H + B_pad * O) * 4     # in + out, x2 buffers
    tb = min(requested, max(UNROLL, budget // max(bytes_per_step, 1)))
    tb = min(tb, _round_up(T, UNROLL))
    return max(UNROLL, (tb // UNROLL) * UNROLL)


def _snn_kernel(cur_ref, w_cat_ref, out_ref, rec_s, v_s, i_s, lv_s, li_s):
    """One grid step = TB time steps of the LIF -> Linear -> LI recurrence.

    cur_ref  : (TB, B, H)   pre-projected input currents (x_t @ W_in^T), VMEM
    w_cat_ref: (H, H + O)   fused [W_rec^T | W_out^T], constant across grid
    out_ref  : (TB, B, O)   readout-voltage slab, one HBM writeback per block
    scratch  : recurrent contribution + LIF/LI state, persists across blocks.
    """
    @pl.when(pl.program_id(0) == 0)
    def _():
        rec_s[...] = jnp.zeros_like(rec_s)
        v_s[...] = jnp.zeros_like(v_s)      # v_leak = 0
        i_s[...] = jnp.zeros_like(i_s)
        lv_s[...] = jnp.zeros_like(lv_s)
        li_s[...] = jnp.zeros_like(li_s)

    tb = cur_ref.shape[0]
    H = rec_s.shape[1]
    # At H=32 the fused weight is ~2 vregs; for H >= 128 prefer reading the ref
    # inside the dot (or a weight-stationary MXU path) to avoid v5e vreg spills.
    w_cat = w_cat_ref[...]                               # (H, H + O)

    def step(t, carry):
        rec, v, i, lv, li = carry

        # --- LIFRecurrentCell (norse lif_step), strength-reduced ---
        v_dec = v * MEM_DECAY + DT_TAU_MEM * i
        i_dec = i * SYN_DECAY
        spike = v_dec > V_TH                             # heaviside forward
        z_new = spike.astype(jnp.float32)
        v_new = jnp.where(spike, V_RESET, v_dec)
        # recurrent term uses z_{t-1}; it was produced by the fused dot at t-1.
        i_new = i_dec + cur_ref[t] + rec

        # --- fused recurrent + readout projection: ONE MXU dot per step ---
        zw = jnp.dot(z_new, w_cat, preferred_element_type=jnp.float32)
        rec_new = zw[:, :H]                              # z_t @ W_rec^T, for t+1
        y = zw[:, H:]                                    # fc_out(z_t)

        # --- LICell (norse li_feed_forward_step), strength-reduced ---
        i_jump = li + y
        lv_new = lv * MEM_DECAY + DT_TAU_MEM * i_jump
        li_new = i_jump * SYN_DECAY

        out_ref[t] = lv_new        # VMEM store; whole slab DMA'd once per block
        return rec_new, v_new, i_new, lv_new, li_new

    carry0 = (rec_s[...], v_s[...], i_s[...], lv_s[...], li_s[...])
    rec, v, i, lv, li = lax.fori_loop(0, tb, step, carry0, unroll=UNROLL)

    # Persist state for the next time block.
    rec_s[...] = rec
    v_s[...] = v
    i_s[...] = i
    lv_s[...] = lv
    li_s[...] = li


def _run_recurrence(in_cur_padded, w_cat, tb, n_blk, B_pad, H, O,
                    single_buffer_weights):
    t_pad = n_blk * tb
    w_spec_kwargs = (dict(pipeline_mode=pl.Buffered(1))
                     if single_buffer_weights else {})
    return pl.pallas_call(
        _snn_kernel,
        out_shape=jax.ShapeDtypeStruct((t_pad, B_pad, O), jnp.float32),
        grid_spec=pltpu.PrefetchScalarGridSpec(
            num_scalar_prefetch=0,
            grid=(n_blk,),                               # serial time blocks
            in_specs=[
                pl.BlockSpec((tb, B_pad, H), lambda b: (b, 0, 0)),
                pl.BlockSpec((H, H + O), lambda b: (0, 0), **w_spec_kwargs),
            ],
            out_specs=pl.BlockSpec((tb, B_pad, O), lambda b: (b, 0, 0)),
            scratch_shapes=[
                pltpu.VMEM((B_pad, H), jnp.float32),   # rec: z_{t-1} @ W_rec^T
                pltpu.VMEM((B_pad, H), jnp.float32),   # LIF v
                pltpu.VMEM((B_pad, H), jnp.float32),   # LIF i
                pltpu.VMEM((B_pad, O), jnp.float32),   # LI (readout) v
                pltpu.VMEM((B_pad, O), jnp.float32),   # LI (readout) i
            ],
        ),
        compiler_params=pltpu.CompilerParams(
            dimension_semantics=("arbitrary",)),        # time carries state
    )(in_cur_padded, w_cat)


def _build_dense_events(x_np, input_features):
    """Vectorized equivalent of the Python event loop in SimpleSNN.forward.

    T = max(ts) and the torch loop runs range(T), so events at ts == T are
    (per the spec) dropped.  Within a batch, events keep their sequence order,
    so last-write-wins assignment matches the original loop.
    """
    B, SEQ, _ = x_np.shape
    T = int(x_np[:, :, 3].max())
    z_dense = np.zeros((T, B, input_features), dtype=np.float32)
    if T > 0:
        rows = x_np[:, :, 0].reshape(-1)
        cols = x_np[:, :, 1].reshape(-1)
        vals = x_np[:, :, 2].reshape(-1).astype(np.float32)
        tss = x_np[:, :, 3].reshape(-1)
        b_idx = np.repeat(np.arange(B), SEQ)
        feat = rows * cols                   # event[0] * event[1], as in torch
        keep = tss < T
        z_dense[tss[keep], b_idx[keep], feat[keep]] = vals[keep]
    return z_dense, T


def simple_snn_forward(x, w_in, w_rec, w_out, time_block=TIME_BLOCK):
    """x: (B, SEQ, 4) events.  Returns (voltages (T, B, OUT) f32, in_cur)."""
    # TODO(synk): T = max(ts) sets the output shape (data-dependent), so this
    # host sync mirrors the torch `.item()`; the dense event grid also stays on
    # the host to preserve last-write-wins semantics for duplicate events.
    x_np = np.asarray(x)
    B = x_np.shape[0]
    H, IN = w_in.shape
    O = w_out.shape[0]

    z_dense_np, T = _build_dense_events(x_np, IN)
    if T == 0:
        return jnp.zeros((0, B, O), jnp.float32), jnp.zeros((0, B, H), jnp.float32)

    z_dense = jnp.asarray(z_dense_np)

    # Hoist the non-recurrent input projection out of the serial loop as ONE
    # GEMM (default MXU precision; the event-valued LHS is exact in bf16).
    in_cur = jnp.dot(z_dense.reshape(T * B, IN), w_in.T).reshape(T, B, H)

    # Fused, pre-transposed weights: [W_rec^T | W_out^T] -> one dot per step.
    w_cat = jnp.concatenate([w_rec.T, w_out.T], axis=1)        # (H, H + O)

    # Pad batch to a full f32 sublane tile; zero rows evolve harmlessly and are
    # sliced off.  Pad time to a whole number of (unroll-aligned) blocks.
    B_pad = _round_up(B, 8)
    tb = _derive_time_block(T, B_pad, H, O, time_block)
    n_blk = (T + tb - 1) // tb
    t_pad = n_blk * tb
    in_cur_padded = jnp.pad(in_cur, ((0, t_pad - T), (0, B_pad - B), (0, 0)))

    try:
        out = jax.block_until_ready(
            _run_recurrence(in_cur_padded, w_cat, tb, n_blk, B_pad, H, O,
                            single_buffer_weights=True))
    except Exception:
        # TODO(synk): pl.Buffered(1) single-buffering of the constant weight
        # block is pure VMEM headroom; fall back if this Mosaic rejects it.
        out = _run_recurrence(in_cur_padded, w_cat, tb, n_blk, B_pad, H, O,
                              single_buffer_weights=False)
    return out[:T, :B], in_cur


def _reference_forward(in_cur, w_rec, w_out):
    """Numpy reference of the same dynamics, consuming the hoisted input
    currents (mathematically identical to per-step x_t @ W_in^T)."""
    T, B, H = in_cur.shape
    O = w_out.shape[0]
    z = np.zeros((B, H), np.float32)
    v = np.zeros((B, H), np.float32)
    i = np.zeros((B, H), np.float32)
    lv = np.zeros((B, O), np.float32)
    li = np.zeros((B, O), np.float32)
    outs = []
    for t in range(T):
        v_dec = (v * MEM_DECAY + DT_TAU_MEM * i).astype(np.float32)
        i_dec = (i * SYN_DECAY).astype(np.float32)
        spike = v_dec > V_TH
        z_new = spike.astype(np.float32)
        v = np.where(spike, np.float32(V_RESET), v_dec).astype(np.float32)
        i = (i_dec + in_cur[t] + z @ w_rec.T).astype(np.float32)
        z = z_new
        y = (z_new @ w_out.T).astype(np.float32)
        i_jump = (li + y).astype(np.float32)
        lv = (lv * MEM_DECAY + DT_TAU_MEM * i_jump).astype(np.float32)
        li = (i_jump * SYN_DECAY).astype(np.float32)
        outs.append(lv.copy())
    return np.stack(outs)


if __name__ == "__main__":
    # small shapes implied by the forward: batch=2, seq=8 events,
    # input_features=16, hidden_features=32, output_features=4
    B, SEQ = 2, 8
    IN, H, O = 16, 32, 4

    key = jax.random.PRNGKey(0)
    k_r, k_c, k_v, k_t, k_win, k_wrec, k_wout = jax.random.split(key, 7)

    # events: [row, col, value, timestamp]; row*col < IN guaranteed (0..3 each)
    rows = jax.random.randint(k_r, (B, SEQ), 0, 4)
    cols = jax.random.randint(k_c, (B, SEQ), 0, 4)
    vals = jax.random.randint(k_v, (B, SEQ), 1, 4)
    tss = jax.random.randint(k_t, (B, SEQ), 0, 6)
    tss = tss.at[0, 0].set(5)                       # ensure T = 5
    x = jnp.stack([rows, cols, vals, tss], axis=-1).astype(jnp.int32)

    def _bf16_exact(a):
        # Round weights to bf16-representable f32 values so the correctness
        # check is insensitive to how the MXU decomposes f32 matmul passes.
        return jnp.asarray(a, jnp.float32).astype(jnp.bfloat16).astype(jnp.float32)

    # deterministic parameter init (input weights scaled up so spikes fire)
    w_in = _bf16_exact(jax.random.normal(k_win, (H, IN)) * np.sqrt(2.0 / IN) * 3.0)
    w_rec = _bf16_exact(jax.random.normal(k_wrec, (H, H)) * np.sqrt(2.0 / H))
    bound = 1.0 / np.sqrt(H)
    w_out = _bf16_exact(jax.random.uniform(k_wout, (O, H), jnp.float32, -bound, bound))

    voltages, in_cur = simple_snn_forward(x, w_in, w_rec, w_out)
    voltages = jax.block_until_ready(voltages)

    ref = _reference_forward(np.asarray(in_cur), np.asarray(w_rec),
                             np.asarray(w_out))
    np.testing.assert_allclose(np.asarray(voltages), ref, rtol=1e-4, atol=1e-5)

    print("KERNEL_OK")
</pallas_src>

<mosaic_0001>
module attributes {stable_mosaic.version = 11 : i64} {
  func.func @_snn_kernel(%arg0: i32, %arg1: memref<8x8x32xf32, #tpu.memory_space<vmem>>, %arg2: memref<32x36xf32, #tpu.memory_space<vmem>>, %arg3: memref<8x8x4xf32, #tpu.memory_space<vmem>>, %arg4: memref<8x32xf32, #tpu.memory_space<vmem>>, %arg5: memref<8x32xf32, #tpu.memory_space<vmem>>, %arg6: memref<8x32xf32, #tpu.memory_space<vmem>>, %arg7: memref<8x4xf32, #tpu.memory_space<vmem>>, %arg8: memref<8x4xf32, #tpu.memory_space<vmem>>) attributes {dimension_semantics = [#tpu.dimension_semantics<arbitrary>], iteration_bounds = array<i64: 1>, scalar_prefetch = 0 : i64, scratch_operands = 5 : i64, tpu.core_type = #tpu.core_type<tc>, window_params = [{transform_indices = @transform_0, window_bounds = array<i64: 8, 8, 32>}, {pipeline_mode = #tpu.pipeline_mode<synchronous>, transform_indices = @transform_1, window_bounds = array<i64: 32, 36>}, {transform_indices = @transform_2, window_bounds = array<i64: 8, 8, 4>}]} {
    %c0_i32 = arith.constant 0 : i32
    %0 = arith.cmpi eq, %arg0, %c0_i32 : i32
    %1 = arith.extui %0 : i1 to i32
    %c0_i32_0 = arith.constant 0 : i32
    %2 = arith.cmpi ne, %1, %c0_i32_0 : i32
    scf.if %2 {
      %cst_126 = arith.constant 0.000000e+00 : f32
      %278 = vector.broadcast %cst_126 : f32 to vector<8x32xf32>
      %c0_127 = arith.constant 0 : index
      %c0_128 = arith.constant 0 : index
      %279 = vector.load %arg4[%c0_127, %c0_128] : memref<8x32xf32, #tpu.memory_space<vmem>>, vector<8x32xf32>
      tpu.vector_store %arg4[%c0_127, %c0_128], %278 {strides = array<i32>} : memref<8x32xf32, #tpu.memory_space<vmem>>, vector<8x32xf32>,
      %cst_129 = arith.constant 0.000000e+00 : f32
      %280 = vector.broadcast %cst_129 : f32 to vector<8x32xf32>
      %c0_130 = arith.constant 0 : index
      %c0_131 = arith.constant 0 : index
      %281 = vector.load %arg5[%c0_130, %c0_131] : memref<8x32xf32, #tpu.memory_space<vmem>>, vector<8x32xf32>
      tpu.vector_store %arg5[%c0_130, %c0_131], %280 {strides = array<i32>} : memref<8x32xf32, #tpu.memory_space<vmem>>, vector<8x32xf32>,
      %cst_132 = arith.constant 0.000000e+00 : f32
      %282 = vector.broadcast %cst_132 : f32 to vector<8x32xf32>
      %c0_133 = arith.constant 0 : index
      %c0_134 = arith.constant 0 : index
      %283 = vector.load %arg6[%c0_133, %c0_134] : memref<8x32xf32, #tpu.memory_space<vmem>>, vector<8x32xf32>
      tpu.vector_store %arg6[%c0_133, %c0_134], %282 {strides = array<i32>} : memref<8x32xf32, #tpu.memory_space<vmem>>, vector<8x32xf32>,
      %cst_135 = arith.constant 0.000000e+00 : f32
      %284 = vector.broadcast %cst_135 : f32 to vector<8x4xf32>
      %c0_136 = arith.constant 0 : index
      %c0_137 = arith.constant 0 : index
      %285 = vector.load %arg7[%c0_136, %c0_137] : memref<8x4xf32, #tpu.memory_space<vmem>>, vector<8x4xf32>
      tpu.vector_store %arg7[%c0_136, %c0_137], %284 {strides = array<i32>} : memref<8x4xf32, #tpu.memory_space<vmem>>, vector<8x4xf32>,
      %cst_138 = arith.constant 0.000000e+00 : f32
      %286 = vector.broadcast %cst_138 : f32 to vector<8x4xf32>
      %c0_139 = arith.constant 0 : index
      %c0_140 = arith.constant 0 : index
      %287 = vector.load %arg8[%c0_139, %c0_140] : memref<8x4xf32, #tpu.memory_space<vmem>>, vector<8x4xf32>
      tpu.vector_store %arg8[%c0_139, %c0_140], %286 {strides = array<i32>} : memref<8x4xf32, #tpu.memory_space<vmem>>, vector<8x4xf32>,
    } else {
    }
    %c0 = arith.constant 0 : index
    %c0_1 = arith.constant 0 : index
    %3 = vector.load %arg2[%c0, %c0_1] : memref<32x36xf32, #tpu.memory_space<vmem>>, vector<32x36xf32>
    %c0_2 = arith.constant 0 : index
    %c0_3 = arith.constant 0 : index
    %4 = vector.load %arg4[%c0_2, %c0_3] : memref<8x32xf32, #tpu.memory_space<vmem>>, vector<8x32xf32>
    %c0_4 = arith.constant 0 : index
    %c0_5 = arith.constant 0 : index
    %5 = vector.load %arg5[%c0_4, %c0_5] : memref<8x32xf32, #tpu.memory_space<vmem>>, vector<8x32xf32>
    %c0_6 = arith.constant 0 : index
    %c0_7 = arith.constant 0 : index
    %6 = vector.load %arg6[%c0_6, %c0_7] : memref<8x32xf32, #tpu.memory_space<vmem>>, vector<8x32xf32>
    %c0_8 = arith.constant 0 : index
    %c0_9 = arith.constant 0 : index
    %7 = vector.load %arg7[%c0_8, %c0_9] : memref<8x4xf32, #tpu.memory_space<vmem>>, vector<8x4xf32>
    %c0_10 = arith.constant 0 : index
    %c0_11 = arith.constant 0 : index
    %8 = vector.load %arg8[%c0_10, %c0_11] : memref<8x4xf32, #tpu.memory_space<vmem>>, vector<8x4xf32>
    %c0_i32_12 = arith.constant 0 : i32
    %cst = arith.constant 0.899999976 : f32
    %9 = vector.broadcast %cst : f32 to vector<8x32xf32>
    %10 = arith.mulf %5, %9 : vector<8x32xf32>
    %cst_13 = arith.constant 1.000000e-01 : f32
    %11 = vector.broadcast %cst_13 : f32 to vector<8x32xf32>
    %12 = arith.mulf %11, %6 : vector<8x32xf32>
    %13 = arith.addf %10, %12 : vector<8x32xf32>
    %cst_14 = arith.constant 8.000000e-01 : f32
    %14 = vector.broadcast %cst_14 : f32 to vector<8x32xf32>
    %15 = arith.mulf %6, %14 : vector<8x32xf32>
    %cst_15 = arith.constant 5.000000e-01 : f32
    %16 = vector.broadcast %cst_15 : f32 to vector<8x32xf32>
    %17 = arith.cmpf ogt, %13, %16 : vector<8x32xf32>
    %18 = arith.extui %17 : vector<8x32xi1> to vector<8x32xi32>
    %19 = arith.sitofp %18 : vector<8x32xi32> to vector<8x32xf32>
    %cst_16 = arith.constant 0.000000e+00 : f32
    %20 = vector.broadcast %cst_16 : f32 to vector<8x32xf32>
    %21 = arith.select %17, %20, %13 : vector<8x32xi1>, vector<8x32xf32>
    %22 = arith.index_cast %c0_i32_12 : i32 to index
    %c0_17 = arith.constant 0 : index
    %c0_18 = arith.constant 0 : index
    %23 = vector.load %arg1[%22, %c0_17, %c0_18] : memref<8x8x32xf32, #tpu.memory_space<vmem>>, vector<1x8x32xf32>
    %24 = vector.shape_cast %23 : vector<1x8x32xf32> to vector<8x32xf32>
    %25 = arith.addf %15, %24 : vector<8x32xf32>
    %26 = arith.addf %25, %4 : vector<8x32xf32>
    %cst_19 = arith.constant dense<0.000000e+00> : vector<8x36xf32>
    %27 = tpu.matmul %19, %3, %cst_19 {dimension_numbers = #tpu.dot_dimension_numbers<[1], [0], [0], [1], [0, 0, 1, 1], [], []>} : vector<8x32xf32>, vector<32x36xf32>, vector<8x36xf32> -> vector<8x36xf32>
    %28 = vector.extract_strided_slice %27 {offsets = [0, 0], sizes = [8, 32], strides = [1, 1]} : vector<8x36xf32> to vector<8x32xf32>
    %29 = vector.extract_strided_slice %27 {offsets = [0, 32], sizes = [8, 4], strides = [1, 1]} : vector<8x36xf32> to vector<8x4xf32>
    %30 = arith.addf %8, %29 : vector<8x4xf32>
    %cst_20 = arith.constant 0.899999976 : f32
    %31 = vector.broadcast %cst_20 : f32 to vector<8x4xf32>
    %32 = arith.mulf %7, %31 : vector<8x4xf32>
    %cst_21 = arith.constant 1.000000e-01 : f32
    %33 = vector.broadcast %cst_21 : f32 to vector<8x4xf32>
    %34 = arith.mulf %33, %30 : vector<8x4xf32>
    %35 = arith.addf %32, %34 : vector<8x4xf32>
    %cst_22 = arith.constant 8.000000e-01 : f32
    %36 = vector.broadcast %cst_22 : f32 to vector<8x4xf32>
    %37 = arith.mulf %30, %36 : vector<8x4xf32>
    %38 = arith.index_cast %c0_i32_12 : i32 to index
    %c0_23 = arith.constant 0 : index
    %c0_24 = arith.constant 0 : index
    %39 = vector.load %arg3[%38, %c0_23, %c0_24] : memref<8x8x4xf32, #tpu.memory_space<vmem>>, vector<1x8x4xf32>
    %40 = vector.shape_cast %39 : vector<1x8x4xf32> to vector<8x4xf32>
    %41 = vector.shape_cast %35 : vector<8x4xf32> to vector<1x8x4xf32>
    tpu.vector_store %arg3[%38, %c0_23, %c0_24], %41 {strides = array<i32>} : memref<8x8x4xf32, #tpu.memory_space<vmem>>, vector<1x8x4xf32>,
    %c1_i32 = arith.constant 1 : i32
    %cst_25 = arith.constant 0.899999976 : f32
    %42 = vector.broadcast %cst_25 : f32 to vector<8x32xf32>
    %43 = arith.mulf %21, %42 : vector<8x32xf32>
    %cst_26 = arith.constant 1.000000e-01 : f32
    %44 = vector.broadcast %cst_26 : f32 to vector<8x32xf32>
    %45 = arith.mulf %44, %26 : vector<8x32xf32>
    %46 = arith.addf %43, %45 : vector<8x32xf32>
    %cst_27 = arith.constant 8.000000e-01 : f32
    %47 = vector.broadcast %cst_27 : f32 to vector<8x32xf32>
    %48 = arith.mulf %26, %47 : vector<8x32xf32>
    %cst_28 = arith.constant 5.000000e-01 : f32
    %49 = vector.broadcast %cst_28 : f32 to vector<8x32xf32>
    %50 = arith.cmpf ogt, %46, %49 : vector<8x32xf32>
    %51 = arith.extui %50 : vector<8x32xi1> to vector<8x32xi32>
    %52 = arith.sitofp %51 : vector<8x32xi32> to vector<8x32xf32>
    %cst_29 = arith.constant 0.000000e+00 : f32
    %53 = vector.broadcast %cst_29 : f32 to vector<8x32xf32>
    %54 = arith.select %50, %53, %46 : vector<8x32xi1>, vector<8x32xf32>
    %55 = arith.index_cast %c1_i32 : i32 to index
    %c0_30 = arith.constant 0 : index
    %c0_31 = arith.constant 0 : index
    %56 = vector.load %arg1[%55, %c0_30, %c0_31] : memref<8x8x32xf32, #tpu.memory_space<vmem>>, vector<1x8x32xf32>
    %57 = vector.shape_cast %56 : vector<1x8x32xf32> to vector<8x32xf32>
    %58 = arith.addf %48, %57 : vector<8x32xf32>
    %59 = arith.addf %58, %28 : vector<8x32xf32>
    %cst_32 = arith.constant dense<0.000000e+00> : vector<8x36xf32>
    %60 = tpu.matmul %52, %3, %cst_32 {dimension_numbers = #tpu.dot_dimension_numbers<[1], [0], [0], [1], [0, 0, 1, 1], [], []>} : vector<8x32xf32>, vector<32x36xf32>, vector<8x36xf32> -> vector<8x36xf32>
    %61 = vector.extract_strided_slice %60 {offsets = [0, 0], sizes = [8, 32], strides = [1, 1]} : vector<8x36xf32> to vector<8x32xf32>
    %62 = vector.extract_strided_slice %60 {offsets = [0, 32], sizes = [8, 4], strides = [1, 1]} : vector<8x36xf32> to vector<8x4xf32>
    %63 = arith.addf %37, %62 : vector<8x4xf32>
    %cst_33 = arith.constant 0.899999976 : f32
    %64 = vector.broadcast %cst_33 : f32 to vector<8x4xf32>
    %65 = arith.mulf %35, %64 : vector<8x4xf32>
    %cst_34 = arith.constant 1.000000e-01 : f32
    %66 = vector.broadcast %cst_34 : f32 to vector<8x4xf32>
    %67 = arith.mulf %66, %63 : vector<8x4xf32>
    %68 = arith.addf %65, %67 : vector<8x4xf32>
    %cst_35 = arith.constant 8.000000e-01 : f32
    %69 = vector.broadcast %cst_35 : f32 to vector<8x4xf32>
    %70 = arith.mulf %63, %69 : vector<8x4xf32>
    %71 = arith.index_cast %c1_i32 : i32 to index
    %c0_36 = arith.constant 0 : index
    %c0_37 = arith.constant 0 : index
    %72 = vector.load %arg3[%71, %c0_36, %c0_37] : memref<8x8x4xf32, #tpu.memory_space<vmem>>, vector<1x8x4xf32>
    %73 = vector.shape_cast %72 : vector<1x8x4xf32> to vector<8x4xf32>
    %74 = vector.shape_cast %68 : vector<8x4xf32> to vector<1x8x4xf32>
    tpu.vector_store %arg3[%71, %c0_36, %c0_37], %74 {strides = array<i32>} : memref<8x8x4xf32, #tpu.memory_space<vmem>>, vector<1x8x4xf32>,
    %c2_i32 = arith.constant 2 : i32
    %cst_38 = arith.constant 0.899999976 : f32
    %75 = vector.broadcast %cst_38 : f32 to vector<8x32xf32>
    %76 = arith.mulf %54, %75 : vector<8x32xf32>
    %cst_39 = arith.constant 1.000000e-01 : f32
    %77 = vector.broadcast %cst_39 : f32 to vector<8x32xf32>
    %78 = arith.mulf %77, %59 : vector<8x32xf32>
    %79 = arith.addf %76, %78 : vector<8x32xf32>
    %cst_40 = arith.constant 8.000000e-01 : f32
    %80 = vector.broadcast %cst_40 : f32 to vector<8x32xf32>
    %81 = arith.mulf %59, %80 : vector<8x32xf32>
    %cst_41 = arith.constant 5.000000e-01 : f32
    %82 = vector.broadcast %cst_41 : f32 to vector<8x32xf32>
    %83 = arith.cmpf ogt, %79, %82 : vector<8x32xf32>
    %84 = arith.extui %83 : vector<8x32xi1> to vector<8x32xi32>
    %85 = arith.sitofp %84 : vector<8x32xi32> to vector<8x32xf32>
    %cst_42 = arith.constant 0.000000e+00 : f32
    %86 = vector.broadcast %cst_42 : f32 to vector<8x32xf32>
    %87 = arith.select %83, %86, %79 : vector<8x32xi1>, vector<8x32xf32>
    %88 = arith.index_cast %c2_i32 : i32 to index
    %c0_43 = arith.constant 0 : index
    %c0_44 = arith.constant 0 : index
    %89 = vector.load %arg1[%88, %c0_43, %c0_44] : memref<8x8x32xf32, #tpu.memory_space<vmem>>, vector<1x8x32xf32>
    %90 = vector.shape_cast %89 : vector<1x8x32xf32> to vector<8x32xf32>
    %91 = arith.addf %81, %90 : vector<8x32xf32>
    %92 = arith.addf %91, %61 : vector<8x32xf32>
    %cst_45 = arith.constant dense<0.000000e+00> : vector<8x36xf32>
    %93 = tpu.matmul %85, %3, %cst_45 {dimension_numbers = #tpu.dot_dimension_numbers<[1], [0], [0], [1], [0, 0, 1, 1], [], []>} : vector<8x32xf32>, vector<32x36xf32>, vector<8x36xf32> -> vector<8x36xf32>
    %94 = vector.extract_strided_slice %93 {offsets = [0, 0], sizes = [8, 32], strides = [1, 1]} : vector<8x36xf32> to vector<8x32xf32>
    %95 = vector.extract_strided_slice %93 {offsets = [0, 32], sizes = [8, 4], strides = [1, 1]} : vector<8x36xf32> to vector<8x4xf32>
    %96 = arith.addf %70, %95 : vector<8x4xf32>
    %cst_46 = arith.constant 0.899999976 : f32
    %97 = vector.broadcast %cst_46 : f32 to vector<8x4xf32>
    %98 = arith.mulf %68, %97 : vector<8x4xf32>
    %cst_47 = arith.constant 1.000000e-01 : f32
    %99 = vector.broadcast %cst_47 : f32 to vector<8x4xf32>
    %100 = arith.mulf %99, %96 : vector<8x4xf32>
    %101 = arith.addf %98, %100 : vector<8x4xf32>
    %cst_48 = arith.constant 8.000000e-01 : f32
    %102 = vector.broadcast %cst_48 : f32 to vector<8x4xf32>
    %103 = arith.mulf %96, %102 : vector<8x4xf32>
    %104 = arith.index_cast %c2_i32 : i32 to index
    %c0_49 = arith.constant 0 : index
    %c0_50 = arith.constant 0 : index
    %105 = vector.load %arg3[%104, %c0_49, %c0_50] : memref<8x8x4xf32, #tpu.memory_space<vmem>>, vector<1x8x4xf32>
    %106 = vector.shape_cast %105 : vector<1x8x4xf32> to vector<8x4xf32>
    %107 = vector.shape_cast %101 : vector<8x4xf32> to vector<1x8x4xf32>
    tpu.vector_store %arg3[%104, %c0_49, %c0_50], %107 {strides = array<i32>} : memref<8x8x4xf32, #tpu.memory_space<vmem>>, vector<1x8x4xf32>,
    %c3_i32 = arith.constant 3 : i32
    %cst_51 = arith.constant 0.899999976 : f32
    %108 = vector.broadcast %cst_51 : f32 to vector<8x32xf32>
    %109 = arith.mulf %87, %108 : vector<8x32xf32>
    %cst_52 = arith.constant 1.000000e-01 : f32
    %110 = vector.broadcast %cst_52 : f32 to vector<8x32xf32>
    %111 = arith.mulf %110, %92 : vector<8x32xf32>
    %112 = arith.addf %109, %111 : vector<8x32xf32>
    %cst_53 = arith.constant 8.000000e-01 : f32
    %113 = vector.broadcast %cst_53 : f32 to vector<8x32xf32>
    %114 = arith.mulf %92, %113 : vector<8x32xf32>
    %cst_54 = arith.constant 5.000000e-01 : f32
    %115 = vector.broadcast %cst_54 : f32 to vector<8x32xf32>
    %116 = arith.cmpf ogt, %112, %115 : vector<8x32xf32>
    %117 = arith.extui %116 : vector<8x32xi1> to vector<8x32xi32>
    %118 = arith.sitofp %117 : vector<8x32xi32> to vector<8x32xf32>
    %cst_55 = arith.constant 0.000000e+00 : f32
    %119 = vector.broadcast %cst_55 : f32 to vector<8x32xf32>
    %120 = arith.select %116, %119, %112 : vector<8x32xi1>, vector<8x32xf32>
    %121 = arith.index_cast %c3_i32 : i32 to index
    %c0_56 = arith.constant 0 : index
    %c0_57 = arith.constant 0 : index
    %122 = vector.load %arg1[%121, %c0_56, %c0_57] : memref<8x8x32xf32, #tpu.memory_space<vmem>>, vector<1x8x32xf32>
    %123 = vector.shape_cast %122 : vector<1x8x32xf32> to vector<8x32xf32>
    %124 = arith.addf %114, %123 : vector<8x32xf32>
    %125 = arith.addf %124, %94 : vector<8x32xf32>
    %cst_58 = arith.constant dense<0.000000e+00> : vector<8x36xf32>
    %126 = tpu.matmul %118, %3, %cst_58 {dimension_numbers = #tpu.dot_dimension_numbers<[1], [0], [0], [1], [0, 0, 1, 1], [], []>} : vector<8x32xf32>, vector<32x36xf32>, vector<8x36xf32> -> vector<8x36xf32>
    %127 = vector.extract_strided_slice %126 {offsets = [0, 0], sizes = [8, 32], strides = [1, 1]} : vector<8x36xf32> to vector<8x32xf32>
    %128 = vector.extract_strided_slice %126 {offsets = [0, 32], sizes = [8, 4], strides = [1, 1]} : vector<8x36xf32> to vector<8x4xf32>
    %129 = arith.addf %103, %128 : vector<8x4xf32>
    %cst_59 = arith.constant 0.899999976 : f32
    %130 = vector.broadcast %cst_59 : f32 to vector<8x4xf32>
    %131 = arith.mulf %101, %130 : vector<8x4xf32>
    %cst_60 = arith.constant 1.000000e-01 : f32
    %132 = vector.broadcast %cst_60 : f32 to vector<8x4xf32>
    %133 = arith.mulf %132, %129 : vector<8x4xf32>
    %134 = arith.addf %131, %133 : vector<8x4xf32>
    %cst_61 = arith.constant 8.000000e-01 : f32
    %135 = vector.broadcast %cst_61 : f32 to vector<8x4xf32>
    %136 = arith.mulf %129, %135 : vector<8x4xf32>
    %137 = arith.index_cast %c3_i32 : i32 to index
    %c0_62 = arith.constant 0 : index
    %c0_63 = arith.constant 0 : index
    %138 = vector.load %arg3[%137, %c0_62, %c0_63] : memref<8x8x4xf32, #tpu.memory_space<vmem>>, vector<1x8x4xf32>
    %139 = vector.shape_cast %138 : vector<1x8x4xf32> to vector<8x4xf32>
    %140 = vector.shape_cast %134 : vector<8x4xf32> to vector<1x8x4xf32>
    tpu.vector_store %arg3[%137, %c0_62, %c0_63], %140 {strides = array<i32>} : memref<8x8x4xf32, #tpu.memory_space<vmem>>, vector<1x8x4xf32>,
    %c4_i32 = arith.constant 4 : i32
    %cst_64 = arith.constant 0.899999976 : f32
    %141 = vector.broadcast %cst_64 : f32 to vector<8x32xf32>
    %142 = arith.mulf %120, %141 : vector<8x32xf32>
    %cst_65 = arith.constant 1.000000e-01 : f32
    %143 = vector.broadcast %cst_65 : f32 to vector<8x32xf32>
    %144 = arith.mulf %143, %125 : vector<8x32xf32>
    %145 = arith.addf %142, %144 : vector<8x32xf32>
    %cst_66 = arith.constant 8.000000e-01 : f32
    %146 = vector.broadcast %cst_66 : f32 to vector<8x32xf32>
    %147 = arith.mulf %125, %146 : vector<8x32xf32>
    %cst_67 = arith.constant 5.000000e-01 : f32
    %148 = vector.broadcast %cst_67 : f32 to vector<8x32xf32>
    %149 = arith.cmpf ogt, %145, %148 : vector<8x32xf32>
    %150 = arith.extui %149 : vector<8x32xi1> to vector<8x32xi32>
    %151 = arith.sitofp %150 : vector<8x32xi32> to vector<8x32xf32>
    %cst_68 = arith.constant 0.000000e+00 : f32
    %152 = vector.broadcast %cst_68 : f32 to vector<8x32xf32>
    %153 = arith.select %149, %152, %145 : vector<8x32xi1>, vector<8x32xf32>
    %154 = arith.index_cast %c4_i32 : i32 to index
    %c0_69 = arith.constant 0 : index
    %c0_70 = arith.constant 0 : index
    %155 = vector.load %arg1[%154, %c0_69, %c0_70] : memref<8x8x32xf32, #tpu.memory_space<vmem>>, vector<1x8x32xf32>
    %156 = vector.shape_cast %155 : vector<1x8x32xf32> to vector<8x32xf32>
    %157 = arith.addf %147, %156 : vector<8x32xf32>
    %158 = arith.addf %157, %127 : vector<8x32xf32>
    %cst_71 = arith.constant dense<0.000000e+00> : vector<8x36xf32>
    %159 = tpu.matmul %151, %3, %cst_71 {dimension_numbers = #tpu.dot_dimension_numbers<[1], [0], [0], [1], [0, 0, 1, 1], [], []>} : vector<8x32xf32>, vector<32x36xf32>, vector<8x36xf32> -> vector<8x36xf32>
    %160 = vector.extract_strided_slice %159 {offsets = [0, 0], sizes = [8, 32], strides = [1, 1]} : vector<8x36xf32> to vector<8x32xf32>
    %161 = vector.extract_strided_slice %159 {offsets = [0, 32], sizes = [8, 4], strides = [1, 1]} : vector<8x36xf32> to vector<8x4xf32>
    %162 = arith.addf %136, %161 : vector<8x4xf32>
    %cst_72 = arith.constant 0.899999976 : f32
    %163 = vector.broadcast %cst_72 : f32 to vector<8x4xf32>
    %164 = arith.mulf %134, %163 : vector<8x4xf32>
    %cst_73 = arith.constant 1.000000e-01 : f32
    %165 = vector.broadcast %cst_73 : f32 to vector<8x4xf32>
    %166 = arith.mulf %165, %162 : vector<8x4xf32>
    %167 = arith.addf %164, %166 : vector<8x4xf32>
    %cst_74 = arith.constant 8.000000e-01 : f32
    %168 = vector.broadcast %cst_74 : f32 to vector<8x4xf32>
    %169 = arith.mulf %162, %168 : vector<8x4xf32>
    %170 = arith.index_cast %c4_i32 : i32 to index
    %c0_75 = arith.constant 0 : index
    %c0_76 = arith.constant 0 : index
    %171 = vector.load %arg3[%170, %c0_75, %c0_76] : memref<8x8x4xf32, #tpu.memory_space<vmem>>, vector<1x8x4xf32>
    %172 = vector.shape_cast %171 : vector<1x8x4xf32> to vector<8x4xf32>
    %173 = vector.shape_cast %167 : vector<8x4xf32> to vector<1x8x4xf32>
    tpu.vector_store %arg3[%170, %c0_75, %c0_76], %173 {strides = array<i32>} : memref<8x8x4xf32, #tpu.memory_space<vmem>>, vector<1x8x4xf32>,
    %c5_i32 = arith.constant 5 : i32
    %cst_77 = arith.constant 0.899999976 : f32
    %174 = vector.broadcast %cst_77 : f32 to vector<8x32xf32>
    %175 = arith.mulf %153, %174 : vector<8x32xf32>
    %cst_78 = arith.constant 1.000000e-01 : f32
    %176 = vector.broadcast %cst_78 : f32 to vector<8x32xf32>
    %177 = arith.mulf %176, %158 : vector<8x32xf32>
    %178 = arith.addf %175, %177 : vector<8x32xf32>
    %cst_79 = arith.constant 8.000000e-01 : f32
    %179 = vector.broadcast %cst_79 : f32 to vector<8x32xf32>
    %180 = arith.mulf %158, %179 : vector<8x32xf32>
    %cst_80 = arith.constant 5.000000e-01 : f32
    %181 = vector.broadcast %cst_80 : f32 to vector<8x32xf32>
    %182 = arith.cmpf ogt, %178, %181 : vector<8x32xf32>
    %183 = arith.extui %182 : vector<8x32xi1> to vector<8x32xi32>
    %184 = arith.sitofp %183 : vector<8x32xi32> to vector<8x32xf32>
    %cst_81 = arith.constant 0.000000e+00 : f32
    %185 = vector.broadcast %cst_81 : f32 to vector<8x32xf32>
    %186 = arith.select %182, %185, %178 : vector<8x32xi1>, vector<8x32xf32>
    %187 = arith.index_cast %c5_i32 : i32 to index
    %c0_82 = arith.constant 0 : index
    %c0_83 = arith.constant 0 : index
    %188 = vector.load %arg1[%187, %c0_82, %c0_83] : memref<8x8x32xf32, #tpu.memory_space<vmem>>, vector<1x8x32xf32>
    %189 = vector.shape_cast %188 : vector<1x8x32xf32> to vector<8x32xf32>
    %190 = arith.addf %180, %189 : vector<8x32xf32>
    %191 = arith.addf %190, %160 : vector<8x32xf32>
    %cst_84 = arith.constant dense<0.000000e+00> : vector<8x36xf32>
    %192 = tpu.matmul %184, %3, %cst_84 {dimension_numbers = #tpu.dot_dimension_numbers<[1], [0], [0], [1], [0, 0, 1, 1], [], []>} : vector<8x32xf32>, vector<32x36xf32>, vector<8x36xf32> -> vector<8x36xf32>
    %193 = vector.extract_strided_slice %192 {offsets = [0, 0], sizes = [8, 32], strides = [1, 1]} : vector<8x36xf32> to vector<8x32xf32>
    %194 = vector.extract_strided_slice %192 {offsets = [0, 32], sizes = [8, 4], strides = [1, 1]} : vector<8x36xf32> to vector<8x4xf32>
    %195 = arith.addf %169, %194 : vector<8x4xf32>
    %cst_85 = arith.constant 0.899999976 : f32
    %196 = vector.broadcast %cst_85 : f32 to vector<8x4xf32>
    %197 = arith.mulf %167, %196 : vector<8x4xf32>
    %cst_86 = arith.constant 1.000000e-01 : f32
    %198 = vector.broadcast %cst_86 : f32 to vector<8x4xf32>
    %199 = arith.mulf %198, %195 : vector<8x4xf32>
    %200 = arith.addf %197, %199 : vector<8x4xf32>
    %cst_87 = arith.constant 8.000000e-01 : f32
    %201 = vector.broadcast %cst_87 : f32 to vector<8x4xf32>
    %202 = arith.mulf %195, %201 : vector<8x4xf32>
    %203 = arith.index_cast %c5_i32 : i32 to index
    %c0_88 = arith.constant 0 : index
    %c0_89 = arith.constant 0 : index
    %204 = vector.load %arg3[%203, %c0_88, %c0_89] : memref<8x8x4xf32, #tpu.memory_space<vmem>>, vector<1x8x4xf32>
    %205 = vector.shape_cast %204 : vector<1x8x4xf32> to vector<8x4xf32>
    %206 = vector.shape_cast %200 : vector<8x4xf32> to vector<1x8x4xf32>
    tpu.vector_store %arg3[%203, %c0_88, %c0_89], %206 {strides = array<i32>} : memref<8x8x4xf32, #tpu.memory_space<vmem>>, vector<1x8x4xf32>,
    %c6_i32 = arith.constant 6 : i32
    %cst_90 = arith.constant 0.899999976 : f32
    %207 = vector.broadcast %cst_90 : f32 to vector<8x32xf32>
    %208 = arith.mulf %186, %207 : vector<8x32xf32>
    %cst_91 = arith.constant 1.000000e-01 : f32
    %209 = vector.broadcast %cst_91 : f32 to vector<8x32xf32>
    %210 = arith.mulf %209, %191 : vector<8x32xf32>
    %211 = arith.addf %208, %210 : vector<8x32xf32>
    %cst_92 = arith.constant 8.000000e-01 : f32
    %212 = vector.broadcast %cst_92 : f32 to vector<8x32xf32>
    %213 = arith.mulf %191, %212 : vector<8x32xf32>
    %cst_93 = arith.constant 5.000000e-01 : f32
    %214 = vector.broadcast %cst_93 : f32 to vector<8x32xf32>
    %215 = arith.cmpf ogt, %211, %214 : vector<8x32xf32>
    %216 = arith.extui %215 : vector<8x32xi1> to vector<8x32xi32>
    %217 = arith.sitofp %216 : vector<8x32xi32> to vector<8x32xf32>
    %cst_94 = arith.constant 0.000000e+00 : f32
    %218 = vector.broadcast %cst_94 : f32 to vector<8x32xf32>
    %219 = arith.select %215, %218, %211 : vector<8x32xi1>, vector<8x32xf32>
    %220 = arith.index_cast %c6_i32 : i32 to index
    %c0_95 = arith.constant 0 : index
    %c0_96 = arith.constant 0 : index
    %221 = vector.load %arg1[%220, %c0_95, %c0_96] : memref<8x8x32xf32, #tpu.memory_space<vmem>>, vector<1x8x32xf32>
    %222 = vector.shape_cast %221 : vector<1x8x32xf32> to vector<8x32xf32>
    %223 = arith.addf %213, %222 : vector<8x32xf32>
    %224 = arith.addf %223, %193 : vector<8x32xf32>
    %cst_97 = arith.constant dense<0.000000e+00> : vector<8x36xf32>
    %225 = tpu.matmul %217, %3, %cst_97 {dimension_numbers = #tpu.dot_dimension_numbers<[1], [0], [0], [1], [0, 0, 1, 1], [], []>} : vector<8x32xf32>, vector<32x36xf32>, vector<8x36xf32> -> vector<8x36xf32>
    %226 = vector.extract_strided_slice %225 {offsets = [0, 0], sizes = [8, 32], strides = [1, 1]} : vector<8x36xf32> to vector<8x32xf32>
    %227 = vector.extract_strided_slice %225 {offsets = [0, 32], sizes = [8, 4], strides = [1, 1]} : vector<8x36xf32> to vector<8x4xf32>
    %228 = arith.addf %202, %227 : vector<8x4xf32>
    %cst_98 = arith.constant 0.899999976 : f32
    %229 = vector.broadcast %cst_98 : f32 to vector<8x4xf32>
    %230 = arith.mulf %200, %229 : vector<8x4xf32>
    %cst_99 = arith.constant 1.000000e-01 : f32
    %231 = vector.broadcast %cst_99 : f32 to vector<8x4xf32>
    %232 = arith.mulf %231, %228 : vector<8x4xf32>
    %233 = arith.addf %230, %232 : vector<8x4xf32>
    %cst_100 = arith.constant 8.000000e-01 : f32
    %234 = vector.broadcast %cst_100 : f32 to vector<8x4xf32>
    %235 = arith.mulf %228, %234 : vector<8x4xf32>
    %236 = arith.index_cast %c6_i32 : i32 to index
    %c0_101 = arith.constant 0 : index
    %c0_102 = arith.constant 0 : index
    %237 = vector.load %arg3[%236, %c0_101, %c0_102] : memref<8x8x4xf32, #tpu.memory_space<vmem>>, vector<1x8x4xf32>
    %238 = vector.shape_cast %237 : vector<1x8x4xf32> to vector<8x4xf32>
    %239 = vector.shape_cast %233 : vector<8x4xf32> to vector<1x8x4xf32>
    tpu.vector_store %arg3[%236, %c0_101, %c0_102], %239 {strides = array<i32>} : memref<8x8x4xf32, #tpu.memory_space<vmem>>, vector<1x8x4xf32>,
    %c7_i32 = arith.constant 7 : i32
    %cst_103 = arith.constant 0.899999976 : f32
    %240 = vector.broadcast %cst_103 : f32 to vector<8x32xf32>
    %241 = arith.mulf %219, %240 : vector<8x32xf32>
    %cst_104 = arith.constant 1.000000e-01 : f32
    %242 = vector.broadcast %cst_104 : f32 to vector<8x32xf32>
    %243 = arith.mulf %242, %224 : vector<8x32xf32>
    %244 = arith.addf %241, %243 : vector<8x32xf32>
    %cst_105 = arith.constant 8.000000e-01 : f32
    %245 = vector.broadcast %cst_105 : f32 to vector<8x32xf32>
    %246 = arith.mulf %224, %245 : vector<8x32xf32>
    %cst_106 = arith.constant 5.000000e-01 : f32
    %247 = vector.broadcast %cst_106 : f32 to vector<8x32xf32>
    %248 = arith.cmpf ogt, %244, %247 : vector<8x32xf32>
    %249 = arith.extui %248 : vector<8x32xi1> to vector<8x32xi32>
    %250 = arith.sitofp %249 : vector<8x32xi32> to vector<8x32xf32>
    %cst_107 = arith.constant 0.000000e+00 : f32
    %251 = vector.broadcast %cst_107 : f32 to vector<8x32xf32>
    %252 = arith.select %248, %251, %244 : vector<8x32xi1>, vector<8x32xf32>
    %253 = arith.index_cast %c7_i32 : i32 to index
    %c0_108 = arith.constant 0 : index
    %c0_109 = arith.constant 0 : index
    %254 = vector.load %arg1[%253, %c0_108, %c0_109] : memref<8x8x32xf32, #tpu.memory_space<vmem>>, vector<1x8x32xf32>
    %255 = vector.shape_cast %254 : vector<1x8x32xf32> to vector<8x32xf32>
    %256 = arith.addf %246, %255 : vector<8x32xf32>
    %257 = arith.addf %256, %226 : vector<8x32xf32>
    %cst_110 = arith.constant dense<0.000000e+00> : vector<8x36xf32>
    %258 = tpu.matmul %250, %3, %cst_110 {dimension_numbers = #tpu.dot_dimension_numbers<[1], [0], [0], [1], [0, 0, 1, 1], [], []>} : vector<8x32xf32>, vector<32x36xf32>, vector<8x36xf32> -> vector<8x36xf32>
    %259 = vector.extract_strided_slice %258 {offsets = [0, 0], sizes = [8, 32], strides = [1, 1]} : vector<8x36xf32> to vector<8x32xf32>
    %260 = vector.extract_strided_slice %258 {offsets = [0, 32], sizes = [8, 4], strides = [1, 1]} : vector<8x36xf32> to vector<8x4xf32>
    %261 = arith.addf %235, %260 : vector<8x4xf32>
    %cst_111 = arith.constant 0.899999976 : f32
    %262 = vector.broadcast %cst_111 : f32 to vector<8x4xf32>
    %263 = arith.mulf %233, %262 : vector<8x4xf32>
    %cst_112 = arith.constant 1.000000e-01 : f32
    %264 = vector.broadcast %cst_112 : f32 to vector<8x4xf32>
    %265 = arith.mulf %264, %261 : vector<8x4xf32>
    %266 = arith.addf %263, %265 : vector<8x4xf32>
    %cst_113 = arith.constant 8.000000e-01 : f32
    %267 = vector.broadcast %cst_113 : f32 to vector<8x4xf32>
    %268 = arith.mulf %261, %267 : vector<8x4xf32>
    %269 = arith.index_cast %c7_i32 : i32 to index
    %c0_114 = arith.constant 0 : index
    %c0_115 = arith.constant 0 : index
    %270 = vector.load %arg3[%269, %c0_114, %c0_115] : memref<8x8x4xf32, #tpu.memory_space<vmem>>, vector<1x8x4xf32>
    %271 = vector.shape_cast %270 : vector<1x8x4xf32> to vector<8x4xf32>
    %272 = vector.shape_cast %266 : vector<8x4xf32> to vector<1x8x4xf32>
    tpu.vector_store %arg3[%269, %c0_114, %c0_115], %272 {strides = array<i32>} : memref<8x8x4xf32, #tpu.memory_space<vmem>>, vector<1x8x4xf32>,
    %c8_i32 = arith.constant 8 : i32
    %c0_116 = arith.constant 0 : index
    %c0_117 = arith.constant 0 : index
    %273 = vector.load %arg4[%c0_116, %c0_117] : memref<8x32xf32, #tpu.memory_space<vmem>>, vector<8x32xf32>
    tpu.vector_store %arg4[%c0_116, %c0_117], %259 {strides = array<i32>} : memref<8x32xf32, #tpu.memory_space<vmem>>, vector<8x32xf32>,
    %c0_118 = arith.constant 0 : index
    %c0_119 = arith.constant 0 : index
    %274 = vector.load %arg5[%c0_118, %c0_119] : memref<8x32xf32, #tpu.memory_space<vmem>>, vector<8x32xf32>
    tpu.vector_store %arg5[%c0_118, %c0_119], %252 {strides = array<i32>} : memref<8x32xf32, #tpu.memory_space<vmem>>, vector<8x32xf32>,
    %c0_120 = arith.constant 0 : index
    %c0_121 = arith.constant 0 : index
    %275 = vector.load %arg6[%c0_120, %c0_121] : memref<8x32xf32, #tpu.memory_space<vmem>>, vector<8x32xf32>
    tpu.vector_store %arg6[%c0_120, %c0_121], %257 {strides = array<i32>} : memref<8x32xf32, #tpu.memory_space<vmem>>, vector<8x32xf32>,
    %c0_122 = arith.constant 0 : index
    %c0_123 = arith.constant 0 : index
    %276 = vector.load %arg7[%c0_122, %c0_123] : memref<8x4xf32, #tpu.memory_space<vmem>>, vector<8x4xf32>
    tpu.vector_store %arg7[%c0_122, %c0_123], %266 {strides = array<i32>} : memref<8x4xf32, #tpu.memory_space<vmem>>, vector<8x4xf32>,
    %c0_124 = arith.constant 0 : index
    %c0_125 = arith.constant 0 : index
    %277 = vector.load %arg8[%c0_124, %c0_125] : memref<8x4xf32, #tpu.memory_space<vmem>>, vector<8x4xf32>
    tpu.vector_store %arg8[%c0_124, %c0_125], %268 {strides = array<i32>} : memref<8x4xf32, #tpu.memory_space<vmem>>, vector<8x4xf32>,
    return
  }
  func.func @transform_0(%arg0: i32) -> (i32, i32, i32) {
    %c0_i32 = arith.constant 0 : i32
    %c0_i32_0 = arith.constant 0 : i32
    %c0_i32_1 = arith.constant 0 : i32
    return %arg0, %c0_i32, %c0_i32_0 : i32, i32, i32
  }
  func.func @transform_1(%arg0: i32) -> (i32, i32) {
    %c0_i32 = arith.constant 0 : i32
    %c0_i32_0 = arith.constant 0 : i32
    %c0_i32_1 = arith.constant 0 : i32
    return %c0_i32, %c0_i32_0 : i32, i32
  }
  func.func @transform_2(%arg0: i32) -> (i32, i32, i32) {
    %c0_i32 = arith.constant 0 : i32
    %c0_i32_0 = arith.constant 0 : i32
    %c0_i32_1 = arith.constant 0 : i32
    return %arg0, %c0_i32, %c0_i32_0 : i32, i32, i32
  }
}

module attributes {stable_mosaic.version = 11 : i64} {
  func.func @_snn_kernel(%arg0: i32, %arg1: memref<8x8x32xf32, #tpu.memory_space<vmem>>, %arg2: memref<32x36xf32, #tpu.memory_space<vmem>>, %arg3: memref<8x8x4xf32, #tpu.memory_space<vmem>>, %arg4: memref<8x32xf32, #tpu.memory_space<vmem>>, %arg5: memref<8x32xf32, #tpu.memory_space<vmem>>, %arg6: memref<8x32xf32, #tpu.memory_space<vmem>>, %arg7: memref<8x4xf32, #tpu.memory_space<vmem>>, %arg8: memref<8x4xf32, #tpu.memory_space<vmem>>) attributes {dimension_semantics = [#tpu.dimension_semantics<arbitrary>], iteration_bounds = array<i64: 1>, scalar_prefetch = 0 : i64, scratch_operands = 5 : i64, tpu.core_type = #tpu.core_type<tc>, window_params = [{transform_indices = @transform_0, window_bounds = array<i64: 8, 8, 32>}, {pipeline_mode = #tpu.pipeline_mode<synchronous>, transform_indices = @transform_1, window_bounds = array<i64: 32, 36>}, {transform_indices = @transform_2, window_bounds = array<i64: 8, 8, 4>}]} {
    %c0_i32 = arith.constant 0 : i32
    %0 = arith.cmpi eq, %arg0, %c0_i32 : i32
    %1 = arith.extui %0 : i1 to i32
    %c0_i32_0 = arith.constant 0 : i32
    %2 = arith.cmpi ne, %1, %c0_i32_0 : i32
    scf.if %2 {
      %cst_126 = arith.constant 0.000000e+00 : f32
      %278 = vector.broadcast %cst_126 : f32 to vector<8x32xf32>
      %c0_127 = arith.constant 0 : index
      %c0_128 = arith.constant 0 : index
      %279 = vector.load %arg4[%c0_127, %c0_128] : memref<8x32xf32, #tpu.memory_space<vmem>>, vector<8x32xf32>
      tpu.vector_store %arg4[%c0_127, %c0_128], %278 {strides = array<i32>} : memref<8x32xf32, #tpu.memory_space<vmem>>, vector<8x32xf32>,
      %cst_129 = arith.constant 0.000000e+00 : f32
      %280 = vector.broadcast %cst_129 : f32 to vector<8x32xf32>
      %c0_130 = arith.constant 0 : index
      %c0_131 = arith.constant 0 : index
      %281 = vector.load %arg5[%c0_130, %c0_131] : memref<8x32xf32, #tpu.memory_space<vmem>>, vector<8x32xf32>
      tpu.vector_store %arg5[%c0_130, %c0_131], %280 {strides = array<i32>} : memref<8x32xf32, #tpu.memory_space<vmem>>, vector<8x32xf32>,
      %cst_132 = arith.constant 0.000000e+00 : f32
      %282 = vector.broadcast %cst_132 : f32 to vector<8x32xf32>
      %c0_133 = arith.constant 0 : index
      %c0_134 = arith.constant 0 : index
      %283 = vector.load %arg6[%c0_133, %c0_134] : memref<8x32xf32, #tpu.memory_space<vmem>>, vector<8x32xf32>
      tpu.vector_store %arg6[%c0_133, %c0_134], %282 {strides = array<i32>} : memref<8x32xf32, #tpu.memory_space<vmem>>, vector<8x32xf32>,
      %cst_135 = arith.constant 0.000000e+00 : f32
      %284 = vector.broadcast %cst_135 : f32 to vector<8x4xf32>
      %c0_136 = arith.constant 0 : index
      %c0_137 = arith.constant 0 : index
      %285 = vector.load %arg7[%c0_136, %c0_137] : memref<8x4xf32, #tpu.memory_space<vmem>>, vector<8x4xf32>
      tpu.vector_store %arg7[%c0_136, %c0_137], %284 {strides = array<i32>} : memref<8x4xf32, #tpu.memory_space<vmem>>, vector<8x4xf32>,
      %cst_138 = arith.constant 0.000000e+00 : f32
      %286 = vector.broadcast %cst_138 : f32 to vector<8x4xf32>
      %c0_139 = arith.constant 0 : index
      %c0_140 = arith.constant 0 : index
      %287 = vector.load %arg8[%c0_139, %c0_140] : memref<8x4xf32, #tpu.memory_space<vmem>>, vector<8x4xf32>
      tpu.vector_store %arg8[%c0_139, %c0_140], %286 {strides = array<i32>} : memref<8x4xf32, #tpu.memory_space<vmem>>, vector<8x4xf32>,
    } else {
    }
    %c0 = arith.constant 0 : index
    %c0_1 = arith.constant 0 : index
    %3 = vector.load %arg2[%c0, %c0_1] : memref<32x36xf32, #tpu.memory_space<vmem>>, vector<32x36xf32>
    %c0_2 = arith.constant 0 : index
    %c0_3 = arith.constant 0 : index
    %4 = vector.load %arg4[%c0_2, %c0_3] : memref<8x32xf32, #tpu.memory_space<vmem>>, vector<8x32xf32>
    %c0_4 = arith.constant 0 : index
    %c0_5 = arith.constant 0 : index
    %5 = vector.load %arg5[%c0_4, %c0_5] : memref<8x32xf32, #tpu.memory_space<vmem>>, vector<8x32xf32>
    %c0_6 = arith.constant 0 : index
    %c0_7 = arith.constant 0 : index
    %6 = vector.load %arg6[%c0_6, %c0_7] : memref<8x32xf32, #tpu.memory_space<vmem>>, vector<8x32xf32>
    %c0_8 = arith.constant 0 : index
    %c0_9 = arith.constant 0 : index
    %7 = vector.load %arg7[%c0_8, %c0_9] : memref<8x4xf32, #tpu.memory_space<vmem>>, vector<8x4xf32>
    %c0_10 = arith.constant 0 : index
    %c0_11 = arith.constant 0 : index
    %8 = vector.load %arg8[%c0_10, %c0_11] : memref<8x4xf32, #tpu.memory_space<vmem>>, vector<8x4xf32>
    %c0_i32_12 = arith.constant 0 : i32
    %cst = arith.constant 0.899999976 : f32
    %9 = vector.broadcast %cst : f32 to vector<8x32xf32>
    %10 = arith.mulf %5, %9 : vector<8x32xf32>
    %cst_13 = arith.constant 1.000000e-01 : f32
    %11 = vector.broadcast %cst_13 : f32 to vector<8x32xf32>
    %12 = arith.mulf %11, %6 : vector<8x32xf32>
    %13 = arith.addf %10, %12 : vector<8x32xf32>
    %cst_14 = arith.constant 8.000000e-01 : f32
    %14 = vector.broadcast %cst_14 : f32 to vector<8x32xf32>
    %15 = arith.mulf %6, %14 : vector<8x32xf32>
    %cst_15 = arith.constant 5.000000e-01 : f32
    %16 = vector.broadcast %cst_15 : f32 to vector<8x32xf32>
    %17 = arith.cmpf ogt, %13, %16 : vector<8x32xf32>
    %18 = arith.extui %17 : vector<8x32xi1> to vector<8x32xi32>
    %19 = arith.sitofp %18 : vector<8x32xi32> to vector<8x32xf32>
    %cst_16 = arith.constant 0.000000e+00 : f32
    %20 = vector.broadcast %cst_16 : f32 to vector<8x32xf32>
    %21 = arith.select %17, %20, %13 : vector<8x32xi1>, vector<8x32xf32>
    %22 = arith.index_cast %c0_i32_12 : i32 to index
    %c0_17 = arith.constant 0 : index
    %c0_18 = arith.constant 0 : index
    %23 = vector.load %arg1[%22, %c0_17, %c0_18] : memref<8x8x32xf32, #tpu.memory_space<vmem>>, vector<1x8x32xf32>
    %24 = vector.shape_cast %23 : vector<1x8x32xf32> to vector<8x32xf32>
    %25 = arith.addf %15, %24 : vector<8x32xf32>
    %26 = arith.addf %25, %4 : vector<8x32xf32>
    %cst_19 = arith.constant dense<0.000000e+00> : vector<8x36xf32>
    %27 = tpu.matmul %19, %3, %cst_19 {dimension_numbers = #tpu.dot_dimension_numbers<[1], [0], [0], [1], [0, 0, 1, 1], [], []>} : vector<8x32xf32>, vector<32x36xf32>, vector<8x36xf32> -> vector<8x36xf32>
    %28 = vector.extract_strided_slice %27 {offsets = [0, 0], sizes = [8, 32], strides = [1, 1]} : vector<8x36xf32> to vector<8x32xf32>
    %29 = vector.extract_strided_slice %27 {offsets = [0, 32], sizes = [8, 4], strides = [1, 1]} : vector<8x36xf32> to vector<8x4xf32>
    %30 = arith.addf %8, %29 : vector<8x4xf32>
    %cst_20 = arith.constant 0.899999976 : f32
    %31 = vector.broadcast %cst_20 : f32 to vector<8x4xf32>
    %32 = arith.mulf %7, %31 : vector<8x4xf32>
    %cst_21 = arith.constant 1.000000e-01 : f32
    %33 = vector.broadcast %cst_21 : f32 to vector<8x4xf32>
    %34 = arith.mulf %33, %30 : vector<8x4xf32>
    %35 = arith.addf %32, %34 : vector<8x4xf32>
    %cst_22 = arith.constant 8.000000e-01 : f32
    %36 = vector.broadcast %cst_22 : f32 to vector<8x4xf32>
    %37 = arith.mulf %30, %36 : vector<8x4xf32>
    %38 = arith.index_cast %c0_i32_12 : i32 to index
    %c0_23 = arith.constant 0 : index
    %c0_24 = arith.constant 0 : index
    %39 = vector.load %arg3[%38, %c0_23, %c0_24] : memref<8x8x4xf32, #tpu.memory_space<vmem>>, vector<1x8x4xf32>
    %40 = vector.shape_cast %39 : vector<1x8x4xf32> to vector<8x4xf32>
    %41 = vector.shape_cast %35 : vector<8x4xf32> to vector<1x8x4xf32>
    tpu.vector_store %arg3[%38, %c0_23, %c0_24], %41 {strides = array<i32>} : memref<8x8x4xf32, #tpu.memory_space<vmem>>, vector<1x8x4xf32>,
    %c1_i32 = arith.constant 1 : i32
    %cst_25 = arith.constant 0.899999976 : f32
    %42 = vector.broadcast %cst_25 : f32 to vector<8x32xf32>
    %43 = arith.mulf %21, %42 : vector<8x32xf32>
    %cst_26 = arith.constant 1.000000e-01 : f32
    %44 = vector.broadcast %cst_26 : f32 to vector<8x32xf32>
    %45 = arith.mulf %44, %26 : vector<8x32xf32>
    %46 = arith.addf %43, %45 : vector<8x32xf32>
    %cst_27 = arith.constant 8.000000e-01 : f32
    %47 = vector.broadcast %cst_27 : f32 to vector<8x32xf32>
    %48 = arith.mulf %26, %47 : vector<8x32xf32>
    %cst_28 = arith.constant 5.000000e-01 : f32
    %49 = vector.broadcast %cst_28 : f32 to vector<8x32xf32>
    %50 = arith.cmpf ogt, %46, %49 : vector<8x32xf32>
    %51 = arith.extui %50 : vector<8x32xi1> to vector<8x32xi32>
    %52 = arith.sitofp %51 : vector<8x32xi32> to vector<8x32xf32>
    %cst_29 = arith.constant 0.000000e+00 : f32
    %53 = vector.broadcast %cst_29 : f32 to vector<8x32xf32>
    %54 = arith.select %50, %53, %46 : vector<8x32xi1>, vector<8x32xf32>
    %55 = arith.index_cast %c1_i32 : i32 to index
    %c0_30 = arith.constant 0 : index
    %c0_31 = arith.constant 0 : index
    %56 = vector.load %arg1[%55, %c0_30, %c0_31] : memref<8x8x32xf32, #tpu.memory_space<vmem>>, vector<1x8x32xf32>
    %57 = vector.shape_cast %56 : vector<1x8x32xf32> to vector<8x32xf32>
    %58 = arith.addf %48, %57 : vector<8x32xf32>
    %59 = arith.addf %58, %28 : vector<8x32xf32>
    %cst_32 = arith.constant dense<0.000000e+00> : vector<8x36xf32>
    %60 = tpu.matmul %52, %3, %cst_32 {dimension_numbers = #tpu.dot_dimension_numbers<[1], [0], [0], [1], [0, 0, 1, 1], [], []>} : vector<8x32xf32>, vector<32x36xf32>, vector<8x36xf32> -> vector<8x36xf32>
    %61 = vector.extract_strided_slice %60 {offsets = [0, 0], sizes = [8, 32], strides = [1, 1]} : vector<8x36xf32> to vector<8x32xf32>
    %62 = vector.extract_strided_slice %60 {offsets = [0, 32], sizes = [8, 4], strides = [1, 1]} : vector<8x36xf32> to vector<8x4xf32>
    %63 = arith.addf %37, %62 : vector<8x4xf32>
    %cst_33 = arith.constant 0.899999976 : f32
    %64 = vector.broadcast %cst_33 : f32 to vector<8x4xf32>
    %65 = arith.mulf %35, %64 : vector<8x4xf32>
    %cst_34 = arith.constant 1.000000e-01 : f32
    %66 = vector.broadcast %cst_34 : f32 to vector<8x4xf32>
    %67 = arith.mulf %66, %63 : vector<8x4xf32>
    %68 = arith.addf %65, %67 : vector<8x4xf32>
    %cst_35 = arith.constant 8.000000e-01 : f32
    %69 = vector.broadcast %cst_35 : f32 to vector<8x4xf32>
    %70 = arith.mulf %63, %69 : vector<8x4xf32>
    %71 = arith.index_cast %c1_i32 : i32 to index
    %c0_36 = arith.constant 0 : index
    %c0_37 = arith.constant 0 : index
    %72 = vector.load %arg3[%71, %c0_36, %c0_37] : memref<8x8x4xf32, #tpu.memory_space<vmem>>, vector<1x8x4xf32>
    %73 = vector.shape_cast %72 : vector<1x8x4xf32> to vector<8x4xf32>
    %74 = vector.shape_cast %68 : vector<8x4xf32> to vector<1x8x4xf32>
    tpu.vector_store %arg3[%71, %c0_36, %c0_37], %74 {strides = array<i32>} : memref<8x8x4xf32, #tpu.memory_space<vmem>>, vector<1x8x4xf32>,
    %c2_i32 = arith.constant 2 : i32
    %cst_38 = arith.constant 0.899999976 : f32
    %75 = vector.broadcast %cst_38 : f32 to vector<8x32xf32>
    %76 = arith.mulf %54, %75 : vector<8x32xf32>
    %cst_39 = arith.constant 1.000000e-01 : f32
    %77 = vector.broadcast %cst_39 : f32 to vector<8x32xf32>
    %78 = arith.mulf %77, %59 : vector<8x32xf32>
    %79 = arith.addf %76, %78 : vector<8x32xf32>
    %cst_40 = arith.constant 8.000000e-01 : f32
    %80 = vector.broadcast %cst_40 : f32 to vector<8x32xf32>
    %81 = arith.mulf %59, %80 : vector<8x32xf32>
    %cst_41 = arith.constant 5.000000e-01 : f32
    %82 = vector.broadcast %cst_41 : f32 to vector<8x32xf32>
    %83 = arith.cmpf ogt, %79, %82 : vector<8x32xf32>
    %84 = arith.extui %83 : vector<8x32xi1> to vector<8x32xi32>
    %85 = arith.sitofp %84 : vector<8x32xi32> to vector<8x32xf32>
    %cst_42 = arith.constant 0.000000e+00 : f32
    %86 = vector.broadcast %cst_42 : f32 to vector<8x32xf32>
    %87 = arith.select %83, %86, %79 : vector<8x32xi1>, vector<8x32xf32>
    %88 = arith.index_cast %c2_i32 : i32 to index
    %c0_43 = arith.constant 0 : index
    %c0_44 = arith.constant 0 : index
    %89 = vector.load %arg1[%88, %c0_43, %c0_44] : memref<8x8x32xf32, #tpu.memory_space<vmem>>, vector<1x8x32xf32>
    %90 = vector.shape_cast %89 : vector<1x8x32xf32> to vector<8x32xf32>
    %91 = arith.addf %81, %90 : vector<8x32xf32>
    %92 = arith.addf %91, %61 : vector<8x32xf32>
    %cst_45 = arith.constant dense<0.000000e+00> : vector<8x36xf32>
    %93 = tpu.matmul %85, %3, %cst_45 {dimension_numbers = #tpu.dot_dimension_numbers<[1], [0], [0], [1], [0, 0, 1, 1], [], []>} : vector<8x32xf32>, vector<32x36xf32>, vector<8x36xf32> -> vector<8x36xf32>
    %94 = vector.extract_strided_slice %93 {offsets = [0, 0], sizes = [8, 32], strides = [1, 1]} : vector<8x36xf32> to vector<8x32xf32>
    %95 = vector.extract_strided_slice %93 {offsets = [0, 32], sizes = [8, 4], strides = [1, 1]} : vector<8x36xf32> to vector<8x4xf32>
    %96 = arith.addf %70, %95 : vector<8x4xf32>
    %cst_46 = arith.constant 0.899999976 : f32
    %97 = vector.broadcast %cst_46 : f32 to vector<8x4xf32>
    %98 = arith.mulf %68, %97 : vector<8x4xf32>
    %cst_47 = arith.constant 1.000000e-01 : f32
    %99 = vector.broadcast %cst_47 : f32 to vector<8x4xf32>
    %100 = arith.mulf %99, %96 : vector<8x4xf32>
    %101 = arith.addf %98, %100 : vector<8x4xf32>
    %cst_48 = arith.constant 8.000000e-01 : f32
    %102 = vector.broadcast %cst_48 : f32 to vector<8x4xf32>
    %103 = arith.mulf %96, %102 : vector<8x4xf32>
    %104 = arith.index_cast %c2_i32 : i32 to index
    %c0_49 = arith.constant 0 : index
    %c0_50 = arith.constant 0 : index
    %105 = vector.load %arg3[%104, %c0_49, %c0_50] : memref<8x8x4xf32, #tpu.memory_space<vmem>>, vector<1x8x4xf32>
    %106 = vector.shape_cast %105 : vector<1x8x4xf32> to vector<8x4xf32>
    %107 = vector.shape_cast %101 : vector<8x4xf32> to vector<1x8x4xf32>
    tpu.vector_store %arg3[%104, %c0_49, %c0_50], %107 {strides = array<i32>} : memref<8x8x4xf32, #tpu.memory_space<vmem>>, vector<1x8x4xf32>,
    %c3_i32 = arith.constant 3 : i32
    %cst_51 = arith.constant 0.899999976 : f32
    %108 = vector.broadcast %cst_51 : f32 to vector<8x32xf32>
    %109 = arith.mulf %87, %108 : vector<8x32xf32>
    %cst_52 = arith.constant 1.000000e-01 : f32
    %110 = vector.broadcast %cst_52 : f32 to vector<8x32xf32>
    %111 = arith.mulf %110, %92 : vector<8x32xf32>
    %112 = arith.addf %109, %111 : vector<8x32xf32>
    %cst_53 = arith.constant 8.000000e-01 : f32
    %113 = vector.broadcast %cst_53 : f32 to vector<8x32xf32>
    %114 = arith.mulf %92, %113 : vector<8x32xf32>
    %cst_54 = arith.constant 5.000000e-01 : f32
    %115 = vector.broadcast %cst_54 : f32 to vector<8x32xf32>
    %116 = arith.cmpf ogt, %112, %115 : vector<8x32xf32>
    %117 = arith.extui %116 : vector<8x32xi1> to vector<8x32xi32>
    %118 = arith.sitofp %117 : vector<8x32xi32> to vector<8x32xf32>
    %cst_55 = arith.constant 0.000000e+00 : f32
    %119 = vector.broadcast %cst_55 : f32 to vector<8x32xf32>
    %120 = arith.select %116, %119, %112 : vector<8x32xi1>, vector<8x32xf32>
    %121 = arith.index_cast %c3_i32 : i32 to index
    %c0_56 = arith.constant 0 : index
    %c0_57 = arith.constant 0 : index
    %122 = vector.load %arg1[%121, %c0_56, %c0_57] : memref<8x8x32xf32, #tpu.memory_space<vmem>>, vector<1x8x32xf32>
    %123 = vector.shape_cast %122 : vector<1x8x32xf32> to vector<8x32xf32>
    %124 = arith.addf %114, %123 : vector<8x32xf32>
    %125 = arith.addf %124, %94 : vector<8x32xf32>
    %cst_58 = arith.constant dense<0.000000e+00> : vector<8x36xf32>
    %126 = tpu.matmul %118, %3, %cst_58 {dimension_numbers = #tpu.dot_dimension_numbers<[1], [0], [0], [1], [0, 0, 1, 1], [], []>} : vector<8x32xf32>, vector<32x36xf32>, vector<8x36xf32> -> vector<8x36xf32>
    %127 = vector.extract_strided_slice %126 {offsets = [0, 0], sizes = [8, 32], strides = [1, 1]} : vector<8x36xf32> to vector<8x32xf32>
    %128 = vector.extract_strided_slice %126 {offsets = [0, 32], sizes = [8, 4], strides = [1, 1]} : vector<8x36xf32> to vector<8x4xf32>
    %129 = arith.addf %103, %128 : vector<8x4xf32>
    %cst_59 = arith.constant 0.899999976 : f32
    %130 = vector.broadcast %cst_59 : f32 to vector<8x4xf32>
    %131 = arith.mulf %101, %130 : vector<8x4xf32>
    %cst_60 = arith.constant 1.000000e-01 : f32
    %132 = vector.broadcast %cst_60 : f32 to vector<8x4xf32>
    %133 = arith.mulf %132, %129 : vector<8x4xf32>
    %134 = arith.addf %131, %133 : vector<8x4xf32>
    %cst_61 = arith.constant 8.000000e-01 : f32
    %135 = vector.broadcast %cst_61 : f32 to vector<8x4xf32>
    %136 = arith.mulf %129, %135 : vector<8x4xf32>
    %137 = arith.index_cast %c3_i32 : i32 to index
    %c0_62 = arith.constant 0 : index
    %c0_63 = arith.constant 0 : index
    %138 = vector.load %arg3[%137, %c0_62, %c0_63] : memref<8x8x4xf32, #tpu.memory_space<vmem>>, vector<1x8x4xf32>
    %139 = vector.shape_cast %138 : vector<1x8x4xf32> to vector<8x4xf32>
    %140 = vector.shape_cast %134 : vector<8x4xf32> to vector<1x8x4xf32>
    tpu.vector_store %arg3[%137, %c0_62, %c0_63], %140 {strides = array<i32>} : memref<8x8x4xf32, #tpu.memory_space<vmem>>, vector<1x8x4xf32>,
    %c4_i32 = arith.constant 4 : i32
    %cst_64 = arith.constant 0.899999976 : f32
    %141 = vector.broadcast %cst_64 : f32 to vector<8x32xf32>
    %142 = arith.mulf %120, %141 : vector<8x32xf32>
    %cst_65 = arith.constant 1.000000e-01 : f32
    %143 = vector.broadcast %cst_65 : f32 to vector<8x32xf32>
    %144 = arith.mulf %143, %125 : vector<8x32xf32>
    %145 = arith.addf %142, %144 : vector<8x32xf32>
    %cst_66 = arith.constant 8.000000e-01 : f32
    %146 = vector.broadcast %cst_66 : f32 to vector<8x32xf32>
    %147 = arith.mulf %125, %146 : vector<8x32xf32>
    %cst_67 = arith.constant 5.000000e-01 : f32
    %148 = vector.broadcast %cst_67 : f32 to vector<8x32xf32>
    %149 = arith.cmpf ogt, %145, %148 : vector<8x32xf32>
    %150 = arith.extui %149 : vector<8x32xi1> to vector<8x32xi32>
    %151 = arith.sitofp %150 : vector<8x32xi32> to vector<8x32xf32>
    %cst_68 = arith.constant 0.000000e+00 : f32
    %152 = vector.broadcast %cst_68 : f32 to vector<8x32xf32>
    %153 = arith.select %149, %152, %145 : vector<8x32xi1>, vector<8x32xf32>
    %154 = arith.index_cast %c4_i32 : i32 to index
    %c0_69 = arith.constant 0 : index
    %c0_70 = arith.constant 0 : index
    %155 = vector.load %arg1[%154, %c0_69, %c0_70] : memref<8x8x32xf32, #tpu.memory_space<vmem>>, vector<1x8x32xf32>
    %156 = vector.shape_cast %155 : vector<1x8x32xf32> to vector<8x32xf32>
    %157 = arith.addf %147, %156 : vector<8x32xf32>
    %158 = arith.addf %157, %127 : vector<8x32xf32>
    %cst_71 = arith.constant dense<0.000000e+00> : vector<8x36xf32>
    %159 = tpu.matmul %151, %3, %cst_71 {dimension_numbers = #tpu.dot_dimension_numbers<[1], [0], [0], [1], [0, 0, 1, 1], [], []>} : vector<8x32xf32>, vector<32x36xf32>, vector<8x36xf32> -> vector<8x36xf32>
    %160 = vector.extract_strided_slice %159 {offsets = [0, 0], sizes = [8, 32], strides = [1, 1]} : vector<8x36xf32> to vector<8x32xf32>
    %161 = vector.extract_strided_slice %159 {offsets = [0, 32], sizes = [8, 4], strides = [1, 1]} : vector<8x36xf32> to vector<8x4xf32>
    %162 = arith.addf %136, %161 : vector<8x4xf32>
    %cst_72 = arith.constant 0.899999976 : f32
    %163 = vector.broadcast %cst_72 : f32 to vector<8x4xf32>
    %164 = arith.mulf %134, %163 : vector<8x4xf32>
    %cst_73 = arith.constant 1.000000e-01 : f32
    %165 = vector.broadcast %cst_73 : f32 to vector<8x4xf32>
    %166 = arith.mulf %165, %162 : vector<8x4xf32>
    %167 = arith.addf %164, %166 : vector<8x4xf32>
    %cst_74 = arith.constant 8.000000e-01 : f32
    %168 = vector.broadcast %cst_74 : f32 to vector<8x4xf32>
    %169 = arith.mulf %162, %168 : vector<8x4xf32>
    %170 = arith.index_cast %c4_i32 : i32 to index
    %c0_75 = arith.constant 0 : index
    %c0_76 = arith.constant 0 : index
    %171 = vector.load %arg3[%170, %c0_75, %c0_76] : memref<8x8x4xf32, #tpu.memory_space<vmem>>, vector<1x8x4xf32>
    %172 = vector.shape_cast %171 : vector<1x8x4xf32> to vector<8x4xf32>
    %173 = vector.shape_cast %167 : vector<8x4xf32> to vector<1x8x4xf32>
    tpu.vector_store %arg3[%170, %c0_75, %c0_76], %173 {strides = array<i32>} : memref<8x8x4xf32, #tpu.memory_space<vmem>>, vector<1x8x4xf32>,
    %c5_i32 = arith.constant 5 : i32
    %cst_77 = arith.constant 0.899999976 : f32
    %174 = vector.broadcast %cst_77 : f32 to vector<8x32xf32>
    %175 = arith.mulf %153, %174 : vector<8x32xf32>
    %cst_78 = arith.constant 1.000000e-01 : f32
    %176 = vector.broadcast %cst_78 : f32 to vector<8x32xf32>
    %177 = arith.mulf %176, %158 : vector<8x32xf32>
    %178 = arith.addf %175, %177 : vector<8x32xf32>
    %cst_79 = arith.constant 8.000000e-01 : f32
    %179 = vector.broadcast %cst_79 : f32 to vector<8x32xf32>
    %180 = arith.mulf %158, %179 : vector<8x32xf32>
    %cst_80 = arith.constant 5.000000e-01 : f32
    %181 = vector.broadcast %cst_80 : f32 to vector<8x32xf32>
    %182 = arith.cmpf ogt, %178, %181 : vector<8x32xf32>
    %183 = arith.extui %182 : vector<8x32xi1> to vector<8x32xi32>
    %184 = arith.sitofp %183 : vector<8x32xi32> to vector<8x32xf32>
    %cst_81 = arith.constant 0.000000e+00 : f32
    %185 = vector.broadcast %cst_81 : f32 to vector<8x32xf32>
    %186 = arith.select %182, %185, %178 : vector<8x32xi1>, vector<8x32xf32>
    %187 = arith.index_cast %c5_i32 : i32 to index
    %c0_82 = arith.constant 0 : index
    %c0_83 = arith.constant 0 : index
    %188 = vector.load %arg1[%187, %c0_82, %c0_83] : memref<8x8x32xf32, #tpu.memory_space<vmem>>, vector<1x8x32xf32>
    %189 = vector.shape_cast %188 : vector<1x8x32xf32> to vector<8x32xf32>
    %190 = arith.addf %180, %189 : vector<8x32xf32>
    %191 = arith.addf %190, %160 : vector<8x32xf32>
    %cst_84 = arith.constant dense<0.000000e+00> : vector<8x36xf32>
    %192 = tpu.matmul %184, %3, %cst_84 {dimension_numbers = #tpu.dot_dimension_numbers<[1], [0], [0], [1], [0, 0, 1, 1], [], []>} : vector<8x32xf32>, vector<32x36xf32>, vector<8x36xf32> -> vector<8x36xf32>
    %193 = vector.extract_strided_slice %192 {offsets = [0, 0], sizes = [8, 32], strides = [1, 1]} : vector<8x36xf32> to vector<8x32xf32>
    %194 = vector.extract_strided_slice %192 {offsets = [0, 32], sizes = [8, 4], strides = [1, 1]} : vector<8x36xf32> to vector<8x4xf32>
    %195 = arith.addf %169, %194 : vector<8x4xf32>
    %cst_85 = arith.constant 0.899999976 : f32
    %196 = vector.broadcast %cst_85 : f32 to vector<8x4xf32>
    %197 = arith.mulf %167, %196 : vector<8x4xf32>
    %cst_86 = arith.constant 1.000000e-01 : f32
    %198 = vector.broadcast %cst_86 : f32 to vector<8x4xf32>
    %199 = arith.mulf %198, %195 : vector<8x4xf32>
    %200 = arith.addf %197, %199 : vector<8x4xf32>
    %cst_87 = arith.constant 8.000000e-01 : f32
    %201 = vector.broadcast %cst_87 : f32 to vector<8x4xf32>
    %202 = arith.mulf %195, %201 : vector<8x4xf32>
    %203 = arith.index_cast %c5_i32 : i32 to index
    %c0_88 = arith.constant 0 : index
    %c0_89 = arith.constant 0 : index
    %204 = vector.load %arg3[%203, %c0_88, %c0_89] : memref<8x8x4xf32, #tpu.memory_space<vmem>>, vector<1x8x4xf32>
    %205 = vector.shape_cast %204 : vector<1x8x4xf32> to vector<8x4xf32>
    %206 = vector.shape_cast %200 : vector<8x4xf32> to vector<1x8x4xf32>
    tpu.vector_store %arg3[%203, %c0_88, %c0_89], %206 {strides = array<i32>} : memref<8x8x4xf32, #tpu.memory_space<vmem>>, vector<1x8x4xf32>,
    %c6_i32 = arith.constant 6 : i32
    %cst_90 = arith.constant 0.899999976 : f32
    %207 = vector.broadcast %cst_90 : f32 to vector<8x32xf32>
    %208 = arith.mulf %186, %207 : vector<8x32xf32>
    %cst_91 = arith.constant 1.000000e-01 : f32
    %209 = vector.broadcast %cst_91 : f32 to vector<8x32xf32>
    %210 = arith.mulf %209, %191 : vector<8x32xf32>
    %211 = arith.addf %208, %210 : vector<8x32xf32>
    %cst_92 = arith.constant 8.000000e-01 : f32
    %212 = vector.broadcast %cst_92 : f32 to vector<8x32xf32>
    %213 = arith.mulf %191, %212 : vector<8x32xf32>
    %cst_93 = arith.constant 5.000000e-01 : f32
    %214 = vector.broadcast %cst_93 : f32 to vector<8x32xf32>
    %215 = arith.cmpf ogt, %211, %214 : vector<8x32xf32>
    %216 = arith.extui %215 : vector<8x32xi1> to vector<8x32xi32>
    %217 = arith.sitofp %216 : vector<8x32xi32> to vector<8x32xf32>
    %cst_94 = arith.constant 0.000000e+00 : f32
    %218 = vector.broadcast %cst_94 : f32 to vector<8x32xf32>
    %219 = arith.select %215, %218, %211 : vector<8x32xi1>, vector<8x32xf32>
    %220 = arith.index_cast %c6_i32 : i32 to index
    %c0_95 = arith.constant 0 : index
    %c0_96 = arith.constant 0 : index
    %221 = vector.load %arg1[%220, %c0_95, %c0_96] : memref<8x8x32xf32, #tpu.memory_space<vmem>>, vector<1x8x32xf32>
    %222 = vector.shape_cast %221 : vector<1x8x32xf32> to vector<8x32xf32>
    %223 = arith.addf %213, %222 : vector<8x32xf32>
    %224 = arith.addf %223, %193 : vector<8x32xf32>
    %cst_97 = arith.constant dense<0.000000e+00> : vector<8x36xf32>
    %225 = tpu.matmul %217, %3, %cst_97 {dimension_numbers = #tpu.dot_dimension_numbers<[1], [0], [0], [1], [0, 0, 1, 1], [], []>} : vector<8x32xf32>, vector<32x36xf32>, vector<8x36xf32> -> vector<8x36xf32>
    %226 = vector.extract_strided_slice %225 {offsets = [0, 0], sizes = [8, 32], strides = [1, 1]} : vector<8x36xf32> to vector<8x32xf32>
    %227 = vector.extract_strided_slice %225 {offsets = [0, 32], sizes = [8, 4], strides = [1, 1]} : vector<8x36xf32> to vector<8x4xf32>
    %228 = arith.addf %202, %227 : vector<8x4xf32>
    %cst_98 = arith.constant 0.899999976 : f32
    %229 = vector.broadcast %cst_98 : f32 to vector<8x4xf32>
    %230 = arith.mulf %200, %229 : vector<8x4xf32>
    %cst_99 = arith.constant 1.000000e-01 : f32
    %231 = vector.broadcast %cst_99 : f32 to vector<8x4xf32>
    %232 = arith.mulf %231, %228 : vector<8x4xf32>
    %233 = arith.addf %230, %232 : vector<8x4xf32>
    %cst_100 = arith.constant 8.000000e-01 : f32
    %234 = vector.broadcast %cst_100 : f32 to vector<8x4xf32>
    %235 = arith.mulf %228, %234 : vector<8x4xf32>
    %236 = arith.index_cast %c6_i32 : i32 to index
    %c0_101 = arith.constant 0 : index
    %c0_102 = arith.constant 0 : index
    %237 = vector.load %arg3[%236, %c0_101, %c0_102] : memref<8x8x4xf32, #tpu.memory_space<vmem>>, vector<1x8x4xf32>
    %238 = vector.shape_cast %237 : vector<1x8x4xf32> to vector<8x4xf32>
    %239 = vector.shape_cast %233 : vector<8x4xf32> to vector<1x8x4xf32>
    tpu.vector_store %arg3[%236, %c0_101, %c0_102], %239 {strides = array<i32>} : memref<8x8x4xf32, #tpu.memory_space<vmem>>, vector<1x8x4xf32>,
    %c7_i32 = arith.constant 7 : i32
    %cst_103 = arith.constant 0.899999976 : f32
    %240 = vector.broadcast %cst_103 : f32 to vector<8x32xf32>
    %241 = arith.mulf %219, %240 : vector<8x32xf32>
    %cst_104 = arith.constant 1.000000e-01 : f32
    %242 = vector.broadcast %cst_104 : f32 to vector<8x32xf32>
    %243 = arith.mulf %242, %224 : vector<8x32xf32>
    %244 = arith.addf %241, %243 : vector<8x32xf32>
    %cst_105 = arith.constant 8.000000e-01 : f32
    %245 = vector.broadcast %cst_105 : f32 to vector<8x32xf32>
    %246 = arith.mulf %224, %245 : vector<8x32xf32>
    %cst_106 = arith.constant 5.000000e-01 : f32
    %247 = vector.broadcast %cst_106 : f32 to vector<8x32xf32>
    %248 = arith.cmpf ogt, %244, %247 : vector<8x32xf32>
    %249 = arith.extui %248 : vector<8x32xi1> to vector<8x32xi32>
    %250 = arith.sitofp %249 : vector<8x32xi32> to vector<8x32xf32>
    %cst_107 = arith.constant 0.000000e+00 : f32
    %251 = vector.broadcast %cst_107 : f32 to vector<8x32xf32>
    %252 = arith.select %248, %251, %244 : vector<8x32xi1>, vector<8x32xf32>
    %253 = arith.index_cast %c7_i32 : i32 to index
    %c0_108 = arith.constant 0 : index
    %c0_109 = arith.constant 0 : index
    %254 = vector.load %arg1[%253, %c0_108, %c0_109] : memref<8x8x32xf32, #tpu.memory_space<vmem>>, vector<1x8x32xf32>
    %255 = vector.shape_cast %254 : vector<1x8x32xf32> to vector<8x32xf32>
    %256 = arith.addf %246, %255 : vector<8x32xf32>
    %257 = arith.addf %256, %226 : vector<8x32xf32>
    %cst_110 = arith.constant dense<0.000000e+00> : vector<8x36xf32>
    %258 = tpu.matmul %250, %3, %cst_110 {dimension_numbers = #tpu.dot_dimension_numbers<[1], [0], [0], [1], [0, 0, 1, 1], [], []>} : vector<8x32xf32>, vector<32x36xf32>, vector<8x36xf32> -> vector<8x36xf32>
    %259 = vector.extract_strided_slice %258 {offsets = [0, 0], sizes = [8, 32], strides = [1, 1]} : vector<8x36xf32> to vector<8x32xf32>
    %260 = vector.extract_strided_slice %258 {offsets = [0, 32], sizes = [8, 4], strides = [1, 1]} : vector<8x36xf32> to vector<8x4xf32>
    %261 = arith.addf %235, %260 : vector<8x4xf32>
    %cst_111 = arith.constant 0.899999976 : f32
    %262 = vector.broadcast %cst_111 : f32 to vector<8x4xf32>
    %263 = arith.mulf %233, %262 : vector<8x4xf32>
    %cst_112 = arith.constant 1.000000e-01 : f32
    %264 = vector.broadcast %cst_112 : f32 to vector<8x4xf32>
    %265 = arith.mulf %264, %261 : vector<8x4xf32>
    %266 = arith.addf %263, %265 : vector<8x4xf32>
    %cst_113 = arith.constant 8.000000e-01 : f32
    %267 = vector.broadcast %cst_113 : f32 to vector<8x4xf32>
    %268 = arith.mulf %261, %267 : vector<8x4xf32>
    %269 = arith.index_cast %c7_i32 : i32 to index
    %c0_114 = arith.constant 0 : index
    %c0_115 = arith.constant 0 : index
    %270 = vector.load %arg3[%269, %c0_114, %c0_115] : memref<8x8x4xf32, #tpu.memory_space<vmem>>, vector<1x8x4xf32>
    %271 = vector.shape_cast %270 : vector<1x8x4xf32> to vector<8x4xf32>
    %272 = vector.shape_cast %266 : vector<8x4xf32> to vector<1x8x4xf32>
    tpu.vector_store %arg3[%269, %c0_114, %c0_115], %272 {strides = array<i32>} : memref<8x8x4xf32, #tpu.memory_space<vmem>>, vector<1x8x4xf32>,
    %c8_i32 = arith.constant 8 : i32
    %c0_116 = arith.constant 0 : index
    %c0_117 = arith.constant 0 : index
    %273 = vector.load %arg4[%c0_116, %c0_117] : memref<8x32xf32, #tpu.memory_space<vmem>>, vector<8x32xf32>
    tpu.vector_store %arg4[%c0_116, %c0_117], %259 {strides = array<i32>} : memref<8x32xf32, #tpu.memory_space<vmem>>, vector<8x32xf32>,
    %c0_118 = arith.constant 0 : index
    %c0_119 = arith.constant 0 : index
    %274 = vector.load %arg5[%c0_118, %c0_119] : memref<8x32xf32, #tpu.memory_space<vmem>>, vector<8x32xf32>
    tpu.vector_store %arg5[%c0_118, %c0_119], %252 {strides = array<i32>} : memref<8x32xf32, #tpu.memory_space<vmem>>, vector<8x32xf32>,
    %c0_120 = arith.constant 0 : index
    %c0_121 = arith.constant 0 : index
    %275 = vector.load %arg6[%c0_120, %c0_121] : memref<8x32xf32, #tpu.memory_space<vmem>>, vector<8x32xf32>
    tpu.vector_store %arg6[%c0_120, %c0_121], %257 {strides = array<i32>} : memref<8x32xf32, #tpu.memory_space<vmem>>, vector<8x32xf32>,
    %c0_122 = arith.constant 0 : index
    %c0_123 = arith.constant 0 : index
    %276 = vector.load %arg7[%c0_122, %c0_123] : memref<8x4xf32, #tpu.memory_space<vmem>>, vector<8x4xf32>
    tpu.vector_store %arg7[%c0_122, %c0_123], %266 {strides = array<i32>} : memref<8x4xf32, #tpu.memory_space<vmem>>, vector<8x4xf32>,
    %c0_124 = arith.constant 0 : index
    %c0_125 = arith.constant 0 : index
    %277 = vector.load %arg8[%c0_124, %c0_125] : memref<8x4xf32, #tpu.memory_space<vmem>>, vector<8x4xf32>
    tpu.vector_store %arg8[%c0_124, %c0_125], %268 {strides = array<i32>} : memref<8x4xf32, #tpu.memory_space<vmem>>, vector<8x4xf32>,
    return
  }
  func.func @transform_0(%arg0: i32) -> (i32, i32, i32) {
    %c0_i32 = arith.constant 0 : i32
    %c0_i32_0 = arith.constant 0 : i32
    %c0_i32_1 = arith.constant 0 : i32
    return %arg0, %c0_i32, %c0_i32_0 : i32, i32, i32
  }
  func.func @transform_1(%arg0: i32) -> (i32, i32) {
    %c0_i32 = arith.constant 0 : i32
    %c0_i32_0 = arith.constant 0 : i32
    %c0_i32_1 = arith.constant 0 : i32
    return %c0_i32, %c0_i32_0 : i32, i32
  }
  func.func @transform_2(%arg0: i32) -> (i32, i32, i32) {
    %c0_i32 = arith.constant 0 : i32
    %c0_i32_0 = arith.constant 0 : i32
    %c0_i32_1 = arith.constant 0 : i32
    return %arg0, %c0_i32, %c0_i32_0 : i32, i32, i32
  }
}

</mosaic_0001>

<bundles_post_ra>
// kernel: tpu_custom_call.1
= control target key start
LH: loop header
LB: loop body
LE: loop exit
PB: predicated region body
PF: predicated region fallthrough
CT: control target
= control target key end

     0   :  { %7 = vsyncpa [#allocation8], 0  ;;  %s1263_s0 = inlined_call_operand.hbm [shape: f32[8,8,32], index: 0, kind: input, shape index: {}]   ;;  %s1264_s1 = inlined_call_operand.hbm [shape: f32[32,36], index: 1, kind: input, shape index: {}]   ;;  %s1265_s2 = inlined_call_operand.vmem [shape: f32[8,8,4], index: 2, kind: output, shape index: {}]  }
   0x1   :  { %8 = vsyncpa [#allocation10], 0  ;;  %s1093_s9 = smov [#allocation7]   ;;  %s1045_s13 = scalar_lea.hbm %s1263_s0, 1024 }
   0x2   :  { %s14_s10 = sshll.u32 %s1093_s9, 4  ;;  %p1046_p0 = scmp.ne.s32.totalorder %s1263_s0, %s1045_s13  ;;  %s15_s10 = int_to_ptr.vmem [resolvable:$true] %s14_s10 }
   0x3   :  { %p1049_p1 = scmp.lt.u32.totalorder %s1045_s13, %s1263_s0 }
   0x5   :  { %p1051_p2 = pnand %p1049_p1, %p1046_p0 }
   0x7   :  { %1054 = shalt.err (!%p1051_p2)
}
   0x8   :  { %s1055_s18 = scalar_lea.vmem %s15_s10, 1024  ;;  %p1060_p4 = scmp.lt.s32.totalorder %s15_s10, %s15_s10 }
   0x9   :  { %p1056_p3 = scmp.ne.s32.totalorder %s15_s10, %s1055_s18  ;;  %p1061_p5 = scmp.lt.s32.totalorder %s1055_s18, %s1055_s18 }
   0xb   :  { %p1062_p6 = por %p1061_p5, %p1060_p4 }
   0xd   :  { %p1063_p7 = pnand %p1062_p6, %p1056_p3 }
   0xf   :  { %1066 = shalt.err (!%p1063_p7)
}
  0x10   :  { %s1094_s19 = smov 128   ;;  %s1095_s20 = smov 8  }
  0x11   :  { %20 = dma.hbm_to_vmem [thread:$0]  %s1263_s0, 1024, %s15_s10, [#allocation8], %s1094_s19, %s1094_s19, %s1095_s20  }
  0x12   :  { %s1096_s23 = smov [#allocation9]   ;;  %s1067_s27 = scalar_lea.hbm %s1264_s1, 512 }
  0x13   :  { %s26_s24 = sshll.u32 %s1096_s23, 4  ;;  %p1068_p8 = scmp.ne.s32.totalorder %s1264_s1, %s1067_s27  ;;  %s27_s24 = int_to_ptr.vmem [resolvable:$true] %s26_s24 }
  0x14   :  { %p1071_p9 = scmp.lt.u32.totalorder %s1067_s27, %s1264_s1 }
  0x16   :  { %p1073_p10 = pnand %p1071_p9, %p1068_p8 }
  0x18   :  { %1076 = shalt.err (!%p1073_p10)
}
  0x19   :  { %s1077_s4 = scalar_lea.vmem %s27_s24, 512  ;;  %p1082_p12 = scmp.lt.s32.totalorder %s27_s24, %s27_s24 }
  0x1a   :  { %p1078_p11 = scmp.ne.s32.totalorder %s27_s24, %s1077_s4  ;;  %p1083_p13 = scmp.lt.s32.totalorder %s1077_s4, %s1077_s4 }
  0x1c   :  { %p1084_p0 = por %p1083_p13, %p1082_p12 }
  0x1e   :  { %p1085_p1 = pnand %p1084_p0, %p1078_p11 }
  0x20   :  { %1088 = shalt.err (!%p1085_p1)
}
  0x21   :  { %32 = dma.hbm_to_vmem [thread:$0]  %s1264_s1, 512, %s27_s24, [#allocation10], %s1094_s19, %s1094_s19, %s1095_s20  }
  0x22   :  { %1089 = dma.done.wait [#allocation8], 1024  }
  0x23   :  { %1090 = vsyncadd [#allocation8], 4294966272 }
  0x24   :  { %1091 = dma.done.wait [#allocation10], 512  }
  0x25   :  { %1092 = vsyncadd [#allocation10], 4294966784  ;;  %vm43_vm0 = vcmask 261120   ;;  %v1097_v0 = vmov 0.0|0.0   ;;  %v1098_v1 = vmov 0.0   ;;  %vm1099_vm1 = vmmov 0  }
  0x26   :  { %989 = vmatprep.subr.bf16.mxu0 %v1097_v0  ;;  %995 = vmatprep.subr.bf16.mxu1 %v1097_v0  ;;  %45 = vst.msk [vmem:[#allocation3] sm:$0xff] %vm43_vm0, %v1098_v1  ;;  %46 = vst.msk [vmem:[#allocation4] sm:$0xff] %vm43_vm0, %v1098_v1  ;;  %v50_v2 = vld [vmem:[#allocation9] sm:$0xff]  ;;  %v51_v3 = vld [vmem:[#allocation9 + $0x8] sm:$0xff]  ;;  %vm47_vm4 = vcmask 31744   ;;  %s1100_s1 = smov 96  }
  0x27   :  { %44 = vst.msk [vmem:[#allocation2] sm:$0xff] %vm43_vm0, %v1098_v1  ;;  %909 = vmatprep.mubr.msk.f32.mxu0 %vm1099_vm1, %v1098_v1  ;;  %920 = vmatprep.mubr.msk.f32.mxu1 %vm1099_vm1, %v1098_v1  ;;  %v52_v4 = vld [vmem:[#allocation9 + $0x10] sm:$0xff]  ;;  %v1152_v5 = vpack.c.bf16 %v51_v3, %v50_v2  ;;  %v53_v6 = vld [vmem:[#allocation9 + $0x18] sm:$0xff]  ;;  %v67_v14 = vld [vmem:[#allocation7] sm:$0xff] }
  0x28   :  { %v1155_v12 = vpack.c.bf16 %v53_v6, %v52_v4  ;;  %48 = vst.msk [vmem:[#allocation5] sm:$0xff] %vm47_vm4, %v1098_v1  ;;  %49 = vst.msk [vmem:[#allocation6] sm:$0xff] %vm47_vm4, %v1098_v1  ;;  %v164_v26 = vld [vmem:[#allocation7 + $0x8] sm:$0xff]  ;;  %v260_v32 = vld [vmem:[#allocation7 + $0x10] sm:$0xff] }
  0x29   :  { %991 = vmatpush3.bf16.msra.mxu0 %v1152_v5  ;;  %997 = vmatpush3.bf16.msra.mxu1 %v1152_v5  ;;  %v356_v61 = vld [vmem:[#allocation7 + $0x18] sm:$0xff]  ;;  %v452_v4 = vld [vmem:[#allocation7 + $0x20] sm:$0xff] }
  0x2a   :  { %992 = vmatprep.subr.bf16.mxu0 %v1097_v0  ;;  %998 = vmatprep.subr.bf16.mxu1 %v1097_v0 }
  0x2d   :  { %v55_v7 = vld [vmem:[#allocation3] sm:$0xff]  ;;  %v56_v8 = vld [vmem:[#allocation4] sm:$0xff]  ;;  %994 = vmatpush3.bf16.msra.mxu0 %v1155_v12  ;;  %1000 = vmatpush3.bf16.msra.mxu1 %v1155_v12 }
  0x2e   :  { %v59_v9 = vmul.f32 0.9, %v55_v7  ;;  %v60_v10 = vmul.f32 0.1, %v56_v8  ;;  %v62_v11 = vmul.f32 0.8, %v56_v8  ;;  %1001 = vmatprep.subr.bf16.mxu0 %v1097_v0  ;;  %1007 = vmatprep.subr.bf16.mxu1 %v1097_v0 }
  0x2f   :  { %v54_v13 = vld [vmem:[#allocation2] sm:$0xff]  ;;  %v57_v47 = vld [vmem:[#allocation5] sm:$0xff] }
  0x30   :  { %v61_v15 = vadd.f32 %v60_v10, %v59_v9  ;;  %v68_v16 = vadd.f32 %v67_v14, %v62_v11  ;;  %v58_v48 = vld [vmem:[#allocation6] sm:$0xff]  ;;  %v149_v50 = vmul.f32 0.9, %v57_v47 }
  0x32   :  { %vm63_vm2 = vcmp.gt.f32.partialorder %v61_v15, 0.5  ;;  %v69_v17 = vadd.f32 %v68_v16, %v54_v13 }
  0x33   :  { %v838_v18 = vsel %vm63_vm2, 1.0, %v1098_v1  ;;  %v66_v19 = vsel %vm63_vm2, 0.0, %v61_v15 }
  0x34   :  { %v155_v20 = vmul.f32 0.9, %v66_v19  ;;  %v156_v21 = vmul.f32 0.1, %v69_v17  ;;  %910 = vmatmul.mubr.msk.f32.vlgmr.msra.gmra.mrb[0].mxu0 %vm43_vm0, %v838_v18  ;;  %v158_v25 = vmul.f32 0.8, %v69_v17 }
  0x35   :  { %1003 = vmatpush3.bf16.msra.mxu0 %v1152_v5  ;;  %931 = vmatprep.mubr.msk.f32.mxu0 %vm1099_vm1, %v1098_v1 }
  0x36   :  { %v157_v22 = vadd.f32 %v156_v21, %v155_v20  ;;  %1004 = vmatprep.subr.bf16.mxu0 %v1097_v0  ;;  %v165_v27 = vadd.f32 %v164_v26, %v158_v25 }
  0x38   :  { %vm159_vm3 = vcmp.gt.f32.partialorder %v157_v22, 0.5 }
  0x39   :  { %v840_v23 = vsel %vm159_vm3, 1.0, %v1098_v1  ;;  %v162_v24 = vsel %vm159_vm3, 0.0, %v157_v22  ;;  %1006 = vmatpush3.bf16.msra.mxu0 %v1155_v12 }
  0x3a   :  { %921 = vmatmul.mubr.msk.f32.vlgmr.msra.gmra.mrb[0].mxu1 %vm43_vm0, %v840_v23  ;;  %1013 = vmatprep.subr.bf16.mxu0 %v1097_v0  ;;  %v251_v29 = vmul.f32 0.9, %v162_v24 }
  0x3b   :  { %1009 = vmatpush3.bf16.msra.mxu1 %v1152_v5  ;;  %942 = vmatprep.mubr.msk.f32.mxu1 %vm1099_vm1, %v1098_v1 }
  0x3c   :  { %1010 = vmatprep.subr.bf16.mxu1 %v1097_v0 }
  0x3f   :  { %1012 = vmatpush3.bf16.msra.mxu1 %v1155_v12 }
  0x40   :  { %1019 = vmatprep.subr.bf16.mxu1 %v1097_v0 }
 0x107   :  { %v140_v28 = vpop.f32.mrb[0].mxu0 }
 0x108   :  { %v166_v30 = vadd.f32 %v165_v27, %v140_v28  ;;  %145 = vrot.lane.b32.xlu0 %v140_v28, %s1100_s1  ;;  %v911_v31 = vpop.f32.mrb[1].mxu0 }
 0x10a   :  { %v252_v33 = vmul.f32 0.1, %v166_v30  ;;  %v254_v34 = vmul.f32 0.8, %v166_v30 }
 0x10c   :  { %v253_v36 = vadd.f32 %v252_v33, %v251_v29  ;;  %v261_v37 = vadd.f32 %v260_v32, %v254_v34 }
 0x10d   :  { %v236_v35 = vpop.f32.mrb[0].mxu1 }
 0x10e   :  { %241 = vrot.lane.b32.xlu0 %v236_v35, %s1100_s1  ;;  %v922_v38 = vpop.f32.mrb[1].mxu1  ;;  %vm255_vm5 = vcmp.gt.f32.partialorder %v253_v36, 0.5  ;;  %v262_v39 = vadd.f32 %v261_v37, %v236_v35  ;;  %v644_v37 = vld [vmem:[#allocation7 + $0x30] sm:$0xff] }
 0x10f   :  { %v258_v40 = vsel %vm255_vm5, 0.0, %v253_v36  ;;  %v843_v41 = vsel %vm255_vm5, 1.0, %v1098_v1 }
 0x110   :  { %v347_v42 = vmul.f32 0.9, %v258_v40  ;;  %v348_v43 = vmul.f32 0.1, %v262_v39  ;;  %932 = vmatmul.mubr.msk.f32.vlgmr.msra.gmra.mrb[2].mxu0 %vm43_vm0, %v843_v41  ;;  %v350_v60 = vmul.f32 0.8, %v262_v39 }
 0x111   :  { %1015 = vmatpush3.bf16.msra.mxu0 %v1152_v5  ;;  %953 = vmatprep.mubr.msk.f32.mxu0 %vm1099_vm1, %v1098_v1 }
 0x112   :  { %v349_v44 = vadd.f32 %v348_v43, %v347_v42  ;;  %1016 = vmatprep.subr.bf16.mxu0 %v1097_v0  ;;  %v357_v62 = vadd.f32 %v356_v61, %v350_v60 }
 0x114   :  { %vm351_vm6 = vcmp.gt.f32.partialorder %v349_v44, 0.5 }
 0x115   :  { %v846_v45 = vsel %vm351_vm6, 1.0, %v1098_v1  ;;  %v354_v46 = vsel %vm351_vm6, 0.0, %v349_v44  ;;  %1018 = vmatpush3.bf16.msra.mxu0 %v1155_v12 }
 0x116   :  { %943 = vmatmul.mubr.msk.f32.vlgmr.msra.gmra.mrb[2].mxu1 %vm43_vm0, %v846_v45  ;;  %1025 = vmatprep.subr.bf16.mxu0 %v1097_v0  ;;  %v443_v6 = vmul.f32 0.9, %v354_v46 }
 0x117   :  { %1021 = vmatpush3.bf16.msra.mxu1 %v1152_v5  ;;  %964 = vmatprep.mubr.msk.f32.mxu1 %vm1099_vm1, %v1098_v1 }
 0x118   :  { %1022 = vmatprep.subr.bf16.mxu1 %v1097_v0 }
 0x11b   :  { %1024 = vmatpush3.bf16.msra.mxu1 %v1155_v12 }
 0x11c   :  { %1031 = vmatprep.subr.bf16.mxu1 %v1097_v0 }
 0x17a   :  { %v146_v49 = vpop.permute.xlu0 %145 }
 0x17b   :  { %v148_v51 = vadd.f32 %v146_v49, %v58_v48 }
 0x17d   :  { %v150_v52 = vmul.f32 0.1, %v148_v51  ;;  %v152_v53 = vmul.f32 0.8, %v148_v51 }
 0x17f   :  { %v151_v55 = vadd.f32 %v150_v52, %v149_v50 }
 0x180   :  { %v242_v54 = vpop.permute.xlu0 %241 }
 0x181   :  { %v244_v56 = vadd.f32 %v242_v54, %v152_v53  ;;  %154 = vst.msk [vmem:[%s1265_s2] sm:$0xff] %vm47_vm4, %v151_v55  ;;  %v245_v57 = vmul.f32 0.9, %v151_v55 }
 0x183   :  { %v246_v58 = vmul.f32 0.1, %v244_v56  ;;  %v248_v22 = vmul.f32 0.8, %v244_v56 }
 0x185   :  { %v247_v59 = vadd.f32 %v246_v58, %v245_v57 }
 0x187   :  { %842 = vst.msk [vmem:[%s1265_s2 + $0x8] sm:$0xff] %vm47_vm4, %v247_v59  ;;  %v341_v25 = vmul.f32 0.9, %v247_v59 }
 0x1e3   :  { %v332_v63 = vpop.f32.mrb[2].mxu0 }
 0x1e4   :  { %v358_v2 = vadd.f32 %v357_v62, %v332_v63  ;;  %337 = vrot.lane.b32.xlu1 %v332_v63, %s1100_s1  ;;  %v933_v3 = vpop.f32.mrb[3].mxu0 }
 0x1e5   :  { %v740_v3 = vld [vmem:[#allocation7 + $0x38] sm:$0xff] }
 0x1e6   :  { %v444_v7 = vmul.f32 0.1, %v358_v2  ;;  %v446_v8 = vmul.f32 0.8, %v358_v2 }
 0x1e8   :  { %v445_v9 = vadd.f32 %v444_v7, %v443_v6  ;;  %v453_v10 = vadd.f32 %v452_v4, %v446_v8 }
 0x1e9   :  { %v428_v11 = vpop.f32.mrb[2].mxu1 }
 0x1ea   :  { %vm447_vm7 = vcmp.gt.f32.partialorder %v445_v9, 0.5  ;;  %v454_v13 = vadd.f32 %v453_v10, %v428_v11  ;;  %433 = vrot.lane.b32.xlu1 %v428_v11, %s1100_s1  ;;  %v944_v14 = vpop.f32.mrb[3].mxu1 }
 0x1eb   :  { %v450_v15 = vsel %vm447_vm7, 0.0, %v445_v9  ;;  %v849_v16 = vsel %vm447_vm7, 1.0, %v1098_v1 }
 0x1ec   :  { %v539_v17 = vmul.f32 0.9, %v450_v15  ;;  %v540_v18 = vmul.f32 0.1, %v454_v13  ;;  %954 = vmatmul.mubr.msk.f32.vlgmr.msra.gmra.mrb[4].mxu0 %vm43_vm0, %v849_v16 }
 0x1ed   :  { %1027 = vmatpush3.bf16.msra.mxu0 %v1152_v5  ;;  %975 = vmatprep.mubr.msk.f32.mxu0 %vm1099_vm1, %v1098_v1 }
 0x1ee   :  { %v541_v19 = vadd.f32 %v540_v18, %v539_v17  ;;  %1028 = vmatprep.subr.bf16.mxu0 %v1097_v0 }
 0x1f0   :  { %vm543_vm8 = vcmp.gt.f32.partialorder %v541_v19, 0.5 }
 0x1f1   :  { %v852_v20 = vsel %vm543_vm8, 1.0, %v1098_v1  ;;  %v546_v21 = vsel %vm543_vm8, 0.0, %v541_v19  ;;  %1030 = vmatpush3.bf16.msra.mxu0 %v1155_v12 }
 0x1f2   :  { %965 = vmatmul.mubr.msk.f32.vlgmr.msra.gmra.mrb[4].mxu1 %vm43_vm0, %v852_v20  ;;  %v635_v38 = vmul.f32 0.9, %v546_v21 }
 0x1f3   :  { %1033 = vmatpush3.bf16.msra.mxu1 %v1152_v5  ;;  %986 = vmatprep.mubr.msk.f32.mxu1 %vm1099_vm1, %v1098_v1 }
 0x1f4   :  { %1034 = vmatprep.subr.bf16.mxu1 %v1097_v0  ;;  %v542_v0 = vmul.f32 0.8, %v454_v13 }
 0x1f7   :  { %1036 = vmatpush3.bf16.msra.mxu1 %v1155_v12  ;;  %v548_v12 = vld [vmem:[#allocation7 + $0x28] sm:$0xff] }
 0x1f8   :  { %v549_v33 = vadd.f32 %v548_v12, %v542_v0 }
 0x256   :  { %v338_v23 = vpop.permute.xlu1 %337 }
 0x257   :  { %v340_v24 = vadd.f32 %v338_v23, %v248_v22 }
 0x259   :  { %v342_v26 = vmul.f32 0.1, %v340_v24  ;;  %v344_v28 = vmul.f32 0.8, %v340_v24 }
 0x25b   :  { %v343_v27 = vadd.f32 %v342_v26, %v341_v25 }
 0x25c   :  { %v434_v29 = vpop.permute.xlu1 %433 }
 0x25d   :  { %845 = vst.msk [vmem:[%s1265_s2 + $0x10] sm:$0xff] %vm47_vm4, %v343_v27  ;;  %v436_v5 = vadd.f32 %v434_v29, %v344_v28  ;;  %v437_v30 = vmul.f32 0.9, %v343_v27 }
 0x25f   :  { %v438_v31 = vmul.f32 0.1, %v436_v5  ;;  %v440_v53 = vmul.f32 0.8, %v436_v5 }
 0x261   :  { %v439_v32 = vadd.f32 %v438_v31, %v437_v30 }
 0x263   :  { %848 = vst.msk [vmem:[%s1265_s2 + $0x18] sm:$0xff] %vm47_vm4, %v439_v32  ;;  %v533_v56 = vmul.f32 0.9, %v439_v32 }
 0x2bf   :  { %v524_v34 = vpop.f32.mrb[4].mxu0 }
 0x2c0   :  { %v550_v35 = vadd.f32 %v549_v33, %v524_v34  ;;  %529 = vrot.lane.b32.xlu0 %v524_v34, %s1100_s1  ;;  %v955_v36 = vpop.f32.mrb[5].mxu0 }
 0x2c2   :  { %v636_v39 = vmul.f32 0.1, %v550_v35  ;;  %v638_v40 = vmul.f32 0.8, %v550_v35 }
 0x2c4   :  { %v637_v41 = vadd.f32 %v636_v39, %v635_v38  ;;  %v645_v42 = vadd.f32 %v644_v37, %v638_v40 }
 0x2c5   :  { %v620_v43 = vpop.f32.mrb[4].mxu1 }
 0x2c6   :  { %vm639_vm9 = vcmp.gt.f32.partialorder %v637_v41, 0.5  ;;  %v646_v44 = vadd.f32 %v645_v42, %v620_v43  ;;  %625 = vrot.lane.b32.xlu1 %v620_v43, %s1100_s1  ;;  %v966_v45 = vpop.f32.mrb[5].mxu1 }
 0x2c7   :  { %v642_v46 = vsel %vm639_vm9, 0.0, %v637_v41  ;;  %v855_v47 = vsel %vm639_vm9, 1.0, %v1098_v1 }
 0x2c8   :  { %v731_v48 = vmul.f32 0.9, %v642_v46  ;;  %v732_v49 = vmul.f32 0.1, %v646_v44  ;;  %976 = vmatmul.mubr.msk.f32.vlgmr.msra.gmra.mrb[6].mxu0 %vm43_vm0, %v855_v47  ;;  %v734_v2 = vmul.f32 0.8, %v646_v44 }
 0x2ca   :  { %v733_v50 = vadd.f32 %v732_v49, %v731_v48  ;;  %v741_v4 = vadd.f32 %v740_v3, %v734_v2 }
 0x2cc   :  { %vm735_vm10 = vcmp.gt.f32.partialorder %v733_v50, 0.5 }
 0x2cd   :  { %v858_v51 = vsel %vm735_vm10, 1.0, %v1098_v1  ;;  %v738_v52 = vsel %vm735_vm10, 0.0, %v733_v50 }
 0x2ce   :  { %987 = vmatmul.mubr.msk.f32.vlgmr.msra.gmra.mrb[6].mxu1 %vm43_vm0, %v858_v51  ;;  %828 = vst.msk [vmem:[#allocation3] sm:$0xff] %vm43_vm0, %v738_v52 }
 0x332   :  { %v530_v54 = vpop.permute.xlu0 %529 }
 0x333   :  { %v532_v55 = vadd.f32 %v530_v54, %v440_v53 }
 0x335   :  { %v534_v57 = vmul.f32 0.1, %v532_v55  ;;  %v536_v59 = vmul.f32 0.8, %v532_v55 }
 0x337   :  { %v535_v58 = vadd.f32 %v534_v57, %v533_v56 }
 0x338   :  { %v626_v60 = vpop.permute.xlu1 %625 }
 0x339   :  { %851 = vst.msk [vmem:[%s1265_s2 + $0x20] sm:$0xff] %vm47_vm4, %v535_v58  ;;  %v628_v61 = vadd.f32 %v626_v60, %v536_v59  ;;  %v629_v1 = vmul.f32 0.9, %v535_v58 }
 0x33b   :  { %v630_v62 = vmul.f32 0.1, %v628_v61  ;;  %v632_v11 = vmul.f32 0.8, %v628_v61 }
 0x33d   :  { %v631_v63 = vadd.f32 %v630_v62, %v629_v1 }
 0x33f   :  { %854 = vst.msk [vmem:[%s1265_s2 + $0x28] sm:$0xff] %vm47_vm4, %v631_v63  ;;  %v725_v15 = vmul.f32 0.9, %v631_v63 }
 0x39b   :  { %v716_v6 = vpop.f32.mrb[6].mxu0 }
 0x39c   :  { %v742_v7 = vadd.f32 %v741_v4, %v716_v6  ;;  %721 = vrot.lane.b32.xlu0 %v716_v6, %s1100_s1  ;;  %v977_v8 = vpop.f32.mrb[7].mxu0 }
 0x39e   :  { %829 = vst.msk [vmem:[#allocation4] sm:$0xff] %vm43_vm0, %v742_v7 }
 0x3a1   :  { %v812_v9 = vpop.f32.mrb[6].mxu1 }
 0x3a2   :  { %827 = vst.msk [vmem:[#allocation2] sm:$0xff] %vm43_vm0, %v812_v9  ;;  %817 = vrot.lane.b32.xlu1 %v812_v9, %s1100_s1  ;;  %v988_v10 = vpop.f32.mrb[7].mxu1 }
 0x40e   :  { %v722_v13 = vpop.permute.xlu0 %721 }
 0x40f   :  { %v724_v14 = vadd.f32 %v722_v13, %v632_v11 }
 0x411   :  { %v726_v16 = vmul.f32 0.1, %v724_v14  ;;  %v728_v18 = vmul.f32 0.8, %v724_v14 }
 0x413   :  { %v727_v17 = vadd.f32 %v726_v16, %v725_v15 }
 0x414   :  { %v818_v19 = vpop.permute.xlu1 %817 }
 0x415   :  { %857 = vst.msk [vmem:[%s1265_s2 + $0x30] sm:$0xff] %vm47_vm4, %v727_v17  ;;  %v820_v20 = vadd.f32 %v818_v19, %v728_v18  ;;  %v821_v21 = vmul.f32 0.9, %v727_v17 }
 0x417   :  { %v822_v22 = vmul.f32 0.1, %v820_v20  ;;  %v824_v23 = vmul.f32 0.8, %v820_v20 }
 0x419   :  { %v823_v24 = vadd.f32 %v822_v22, %v821_v21  ;;  %831 = vst.msk [vmem:[#allocation6] sm:$0xff] %vm47_vm4, %v824_v23 }
 0x41b   :  { %860 = vst.msk [vmem:[%s1265_s2 + $0x38] sm:$0xff] %vm47_vm4, %v823_v24  ;;  %830 = vst.msk [vmem:[#allocation5] sm:$0xff] %vm47_vm4, %v823_v24 }
 0x41c   :  { %836 = vsyncpa [#allocation8], 1 }
 0x41d   :  { %837 = vsyncpa [#allocation10], 1 }

// kernel: tpu_custom_call.1
= control target key start
LH: loop header
LB: loop body
LE: loop exit
PB: predicated region body
PF: predicated region fallthrough
CT: control target
= control target key end

     0   :  { %7 = vsyncpa [#allocation8], 0  ;;  %s1263_s0 = inlined_call_operand.hbm [shape: f32[8,8,32], index: 0, kind: input, shape index: {}]   ;;  %s1264_s1 = inlined_call_operand.hbm [shape: f32[32,36], index: 1, kind: input, shape index: {}]   ;;  %s1265_s2 = inlined_call_operand.vmem [shape: f32[8,8,4], index: 2, kind: output, shape index: {}]  }
   0x1   :  { %8 = vsyncpa [#allocation10], 0  ;;  %s1093_s9 = smov [#allocation7]   ;;  %s1045_s13 = scalar_lea.hbm %s1263_s0, 1024 }
   0x2   :  { %s14_s10 = sshll.u32 %s1093_s9, 4  ;;  %p1046_p0 = scmp.ne.s32.totalorder %s1263_s0, %s1045_s13  ;;  %s15_s10 = int_to_ptr.vmem [resolvable:$true] %s14_s10 }
   0x3   :  { %p1049_p1 = scmp.lt.u32.totalorder %s1045_s13, %s1263_s0 }
   0x5   :  { %p1051_p2 = pnand %p1049_p1, %p1046_p0 }
   0x7   :  { %1054 = shalt.err (!%p1051_p2)
}
   0x8   :  { %s1055_s18 = scalar_lea.vmem %s15_s10, 1024  ;;  %p1060_p4 = scmp.lt.s32.totalorder %s15_s10, %s15_s10 }
   0x9   :  { %p1056_p3 = scmp.ne.s32.totalorder %s15_s10, %s1055_s18  ;;  %p1061_p5 = scmp.lt.s32.totalorder %s1055_s18, %s1055_s18 }
   0xb   :  { %p1062_p6 = por %p1061_p5, %p1060_p4 }
   0xd   :  { %p1063_p7 = pnand %p1062_p6, %p1056_p3 }
   0xf   :  { %1066 = shalt.err (!%p1063_p7)
}
  0x10   :  { %s1094_s19 = smov 128   ;;  %s1095_s20 = smov 8  }
  0x11   :  { %20 = dma.hbm_to_vmem [thread:$0]  %s1263_s0, 1024, %s15_s10, [#allocation8], %s1094_s19, %s1094_s19, %s1095_s20  }
  0x12   :  { %s1096_s23 = smov [#allocation9]   ;;  %s1067_s27 = scalar_lea.hbm %s1264_s1, 512 }
  0x13   :  { %s26_s24 = sshll.u32 %s1096_s23, 4  ;;  %p1068_p8 = scmp.ne.s32.totalorder %s1264_s1, %s1067_s27  ;;  %s27_s24 = int_to_ptr.vmem [resolvable:$true] %s26_s24 }
  0x14   :  { %p1071_p9 = scmp.lt.u32.totalorder %s1067_s27, %s1264_s1 }
  0x16   :  { %p1073_p10 = pnand %p1071_p9, %p1068_p8 }
  0x18   :  { %1076 = shalt.err (!%p1073_p10)
}
  0x19   :  { %s1077_s4 = scalar_lea.vmem %s27_s24, 512  ;;  %p1082_p12 = scmp.lt.s32.totalorder %s27_s24, %s27_s24 }
  0x1a   :  { %p1078_p11 = scmp.ne.s32.totalorder %s27_s24, %s1077_s4  ;;  %p1083_p13 = scmp.lt.s32.totalorder %s1077_s4, %s1077_s4 }
  0x1c   :  { %p1084_p0 = por %p1083_p13, %p1082_p12 }
  0x1e   :  { %p1085_p1 = pnand %p1084_p0, %p1078_p11 }
  0x20   :  { %1088 = shalt.err (!%p1085_p1)
}
  0x21   :  { %32 = dma.hbm_to_vmem [thread:$0]  %s1264_s1, 512, %s27_s24, [#allocation10], %s1094_s19, %s1094_s19, %s1095_s20  }
  0x22   :  { %1089 = dma.done.wait [#allocation8], 1024  }
  0x23   :  { %1090 = vsyncadd [#allocation8], 4294966272 }
  0x24   :  { %1091 = dma.done.wait [#allocation10], 512  }
  0x25   :  { %1092 = vsyncadd [#allocation10], 4294966784  ;;  %vm43_vm0 = vcmask 261120   ;;  %v1097_v0 = vmov 0.0|0.0   ;;  %v1098_v1 = vmov 0.0   ;;  %vm1099_vm1 = vmmov 0  }
  0x26   :  { %989 = vmatprep.subr.bf16.mxu0 %v1097_v0  ;;  %995 = vmatprep.subr.bf16.mxu1 %v1097_v0  ;;  %45 = vst.msk [vmem:[#allocation3] sm:$0xff] %vm43_vm0, %v1098_v1  ;;  %46 = vst.msk [vmem:[#allocation4] sm:$0xff] %vm43_vm0, %v1098_v1  ;;  %v50_v2 = vld [vmem:[#allocation9] sm:$0xff]  ;;  %v51_v3 = vld [vmem:[#allocation9 + $0x8] sm:$0xff]  ;;  %vm47_vm4 = vcmask 31744   ;;  %s1100_s1 = smov 96  }
  0x27   :  { %44 = vst.msk [vmem:[#allocation2] sm:$0xff] %vm43_vm0, %v1098_v1  ;;  %909 = vmatprep.mubr.msk.f32.mxu0 %vm1099_vm1, %v1098_v1  ;;  %920 = vmatprep.mubr.msk.f32.mxu1 %vm1099_vm1, %v1098_v1  ;;  %v52_v4 = vld [vmem:[#allocation9 + $0x10] sm:$0xff]  ;;  %v1152_v5 = vpack.c.bf16 %v51_v3, %v50_v2  ;;  %v53_v6 = vld [vmem:[#allocation9 + $0x18] sm:$0xff]  ;;  %v67_v14 = vld [vmem:[#allocation7] sm:$0xff] }
  0x28   :  { %v1155_v12 = vpack.c.bf16 %v53_v6, %v52_v4  ;;  %48 = vst.msk [vmem:[#allocation5] sm:$0xff] %vm47_vm4, %v1098_v1  ;;  %49 = vst.msk [vmem:[#allocation6] sm:$0xff] %vm47_vm4, %v1098_v1  ;;  %v164_v26 = vld [vmem:[#allocation7 + $0x8] sm:$0xff]  ;;  %v260_v32 = vld [vmem:[#allocation7 + $0x10] sm:$0xff] }
  0x29   :  { %991 = vmatpush3.bf16.msra.mxu0 %v1152_v5  ;;  %997 = vmatpush3.bf16.msra.mxu1 %v1152_v5  ;;  %v356_v61 = vld [vmem:[#allocation7 + $0x18] sm:$0xff]  ;;  %v452_v4 = vld [vmem:[#allocation7 + $0x20] sm:$0xff] }
  0x2a   :  { %992 = vmatprep.subr.bf16.mxu0 %v1097_v0  ;;  %998 = vmatprep.subr.bf16.mxu1 %v1097_v0 }
  0x2d   :  { %v55_v7 = vld [vmem:[#allocation3] sm:$0xff]  ;;  %v56_v8 = vld [vmem:[#allocation4] sm:$0xff]  ;;  %994 = vmatpush3.bf16.msra.mxu0 %v1155_v12  ;;  %1000 = vmatpush3.bf16.msra.mxu1 %v1155_v12 }
  0x2e   :  { %v59_v9 = vmul.f32 0.9, %v55_v7  ;;  %v60_v10 = vmul.f32 0.1, %v56_v8  ;;  %v62_v11 = vmul.f32 0.8, %v56_v8  ;;  %1001 = vmatprep.subr.bf16.mxu0 %v1097_v0  ;;  %1007 = vmatprep.subr.bf16.mxu1 %v1097_v0 }
  0x2f   :  { %v54_v13 = vld [vmem:[#allocation2] sm:$0xff]  ;;  %v57_v47 = vld [vmem:[#allocation5] sm:$0xff] }
  0x30   :  { %v61_v15 = vadd.f32 %v60_v10, %v59_v9  ;;  %v68_v16 = vadd.f32 %v67_v14, %v62_v11  ;;  %v58_v48 = vld [vmem:[#allocation6] sm:$0xff]  ;;  %v149_v50 = vmul.f32 0.9, %v57_v47 }
  0x32   :  { %vm63_vm2 = vcmp.gt.f32.partialorder %v61_v15, 0.5  ;;  %v69_v17 = vadd.f32 %v68_v16, %v54_v13 }
  0x33   :  { %v838_v18 = vsel %vm63_vm2, 1.0, %v1098_v1  ;;  %v66_v19 = vsel %vm63_vm2, 0.0, %v61_v15 }
  0x34   :  { %v155_v20 = vmul.f32 0.9, %v66_v19  ;;  %v156_v21 = vmul.f32 0.1, %v69_v17  ;;  %910 = vmatmul.mubr.msk.f32.vlgmr.msra.gmra.mrb[0].mxu0 %vm43_vm0, %v838_v18  ;;  %v158_v25 = vmul.f32 0.8, %v69_v17 }
  0x35   :  { %1003 = vmatpush3.bf16.msra.mxu0 %v1152_v5  ;;  %931 = vmatprep.mubr.msk.f32.mxu0 %vm1099_vm1, %v1098_v1 }
  0x36   :  { %v157_v22 = vadd.f32 %v156_v21, %v155_v20  ;;  %1004 = vmatprep.subr.bf16.mxu0 %v1097_v0  ;;  %v165_v27 = vadd.f32 %v164_v26, %v158_v25 }
  0x38   :  { %vm159_vm3 = vcmp.gt.f32.partialorder %v157_v22, 0.5 }
  0x39   :  { %v840_v23 = vsel %vm159_vm3, 1.0, %v1098_v1  ;;  %v162_v24 = vsel %vm159_vm3, 0.0, %v157_v22  ;;  %1006 = vmatpush3.bf16.msra.mxu0 %v1155_v12 }
  0x3a   :  { %921 = vmatmul.mubr.msk.f32.vlgmr.msra.gmra.mrb[0].mxu1 %vm43_vm0, %v840_v23  ;;  %1013 = vmatprep.subr.bf16.mxu0 %v1097_v0  ;;  %v251_v29 = vmul.f32 0.9, %v162_v24 }
  0x3b   :  { %1009 = vmatpush3.bf16.msra.mxu1 %v1152_v5  ;;  %942 = vmatprep.mubr.msk.f32.mxu1 %vm1099_vm1, %v1098_v1 }
  0x3c   :  { %1010 = vmatprep.subr.bf16.mxu1 %v1097_v0 }
  0x3f   :  { %1012 = vmatpush3.bf16.msra.mxu1 %v1155_v12 }
  0x40   :  { %1019 = vmatprep.subr.bf16.mxu1 %v1097_v0 }
 0x107   :  { %v140_v28 = vpop.f32.mrb[0].mxu0 }
 0x108   :  { %v166_v30 = vadd.f32 %v165_v27, %v140_v28  ;;  %145 = vrot.lane.b32.xlu0 %v140_v28, %s1100_s1  ;;  %v911_v31 = vpop.f32.mrb[1].mxu0 }
 0x10a   :  { %v252_v33 = vmul.f32 0.1, %v166_v30  ;;  %v254_v34 = vmul.f32 0.8, %v166_v30 }
 0x10c   :  { %v253_v36 = vadd.f32 %v252_v33, %v251_v29  ;;  %v261_v37 = vadd.f32 %v260_v32, %v254_v34 }
 0x10d   :  { %v236_v35 = vpop.f32.mrb[0].mxu1 }
 0x10e   :  { %241 = vrot.lane.b32.xlu0 %v236_v35, %s1100_s1  ;;  %v922_v38 = vpop.f32.mrb[1].mxu1  ;;  %vm255_vm5 = vcmp.gt.f32.partialorder %v253_v36, 0.5  ;;  %v262_v39 = vadd.f32 %v261_v37, %v236_v35  ;;  %v644_v37 = vld [vmem:[#allocation7 + $0x30] sm:$0xff] }
 0x10f   :  { %v258_v40 = vsel %vm255_vm5, 0.0, %v253_v36  ;;  %v843_v41 = vsel %vm255_vm5, 1.0, %v1098_v1 }
 0x110   :  { %v347_v42 = vmul.f32 0.9, %v258_v40  ;;  %v348_v43 = vmul.f32 0.1, %v262_v39  ;;  %932 = vmatmul.mubr.msk.f32.vlgmr.msra.gmra.mrb[2].mxu0 %vm43_vm0, %v843_v41  ;;  %v350_v60 = vmul.f32 0.8, %v262_v39 }
 0x111   :  { %1015 = vmatpush3.bf16.msra.mxu0 %v1152_v5  ;;  %953 = vmatprep.mubr.msk.f32.mxu0 %vm1099_vm1, %v1098_v1 }
 0x112   :  { %v349_v44 = vadd.f32 %v348_v43, %v347_v42  ;;  %1016 = vmatprep.subr.bf16.mxu0 %v1097_v0  ;;  %v357_v62 = vadd.f32 %v356_v61, %v350_v60 }
 0x114   :  { %vm351_vm6 = vcmp.gt.f32.partialorder %v349_v44, 0.5 }
 0x115   :  { %v846_v45 = vsel %vm351_vm6, 1.0, %v1098_v1  ;;  %v354_v46 = vsel %vm351_vm6, 0.0, %v349_v44  ;;  %1018 = vmatpush3.bf16.msra.mxu0 %v1155_v12 }
 0x116   :  { %943 = vmatmul.mubr.msk.f32.vlgmr.msra.gmra.mrb[2].mxu1 %vm43_vm0, %v846_v45  ;;  %1025 = vmatprep.subr.bf16.mxu0 %v1097_v0  ;;  %v443_v6 = vmul.f32 0.9, %v354_v46 }
 0x117   :  { %1021 = vmatpush3.bf16.msra.mxu1 %v1152_v5  ;;  %964 = vmatprep.mubr.msk.f32.mxu1 %vm1099_vm1, %v1098_v1 }
 0x118   :  { %1022 = vmatprep.subr.bf16.mxu1 %v1097_v0 }
 0x11b   :  { %1024 = vmatpush3.bf16.msra.mxu1 %v1155_v12 }
 0x11c   :  { %1031 = vmatprep.subr.bf16.mxu1 %v1097_v0 }
 0x17a   :  { %v146_v49 = vpop.permute.xlu0 %145 }
 0x17b   :  { %v148_v51 = vadd.f32 %v146_v49, %v58_v48 }
 0x17d   :  { %v150_v52 = vmul.f32 0.1, %v148_v51  ;;  %v152_v53 = vmul.f32 0.8, %v148_v51 }
 0x17f   :  { %v151_v55 = vadd.f32 %v150_v52, %v149_v50 }
 0x180   :  { %v242_v54 = vpop.permute.xlu0 %241 }
 0x181   :  { %v244_v56 = vadd.f32 %v242_v54, %v152_v53  ;;  %154 = vst.msk [vmem:[%s1265_s2] sm:$0xff] %vm47_vm4, %v151_v55  ;;  %v245_v57 = vmul.f32 0.9, %v151_v55 }
 0x183   :  { %v246_v58 = vmul.f32 0.1, %v244_v56  ;;  %v248_v22 = vmul.f32 0.8, %v244_v56 }
 0x185   :  { %v247_v59 = vadd.f32 %v246_v58, %v245_v57 }
 0x187   :  { %842 = vst.msk [vmem:[%s1265_s2 + $0x8] sm:$0xff] %vm47_vm4, %v247_v59  ;;  %v341_v25 = vmul.f32 0.9, %v247_v59 }
 0x1e3   :  { %v332_v63 = vpop.f32.mrb[2].mxu0 }
 0x1e4   :  { %v358_v2 = vadd.f32 %v357_v62, %v332_v63  ;;  %337 = vrot.lane.b32.xlu1 %v332_v63, %s1100_s1  ;;  %v933_v3 = vpop.f32.mrb[3].mxu0 }
 0x1e5   :  { %v740_v3 = vld [vmem:[#allocation7 + $0x38] sm:$0xff] }
 0x1e6   :  { %v444_v7 = vmul.f32 0.1, %v358_v2  ;;  %v446_v8 = vmul.f32 0.8, %v358_v2 }
 0x1e8   :  { %v445_v9 = vadd.f32 %v444_v7, %v443_v6  ;;  %v453_v10 = vadd.f32 %v452_v4, %v446_v8 }
 0x1e9   :  { %v428_v11 = vpop.f32.mrb[2].mxu1 }
 0x1ea   :  { %vm447_vm7 = vcmp.gt.f32.partialorder %v445_v9, 0.5  ;;  %v454_v13 = vadd.f32 %v453_v10, %v428_v11  ;;  %433 = vrot.lane.b32.xlu1 %v428_v11, %s1100_s1  ;;  %v944_v14 = vpop.f32.mrb[3].mxu1 }
 0x1eb   :  { %v450_v15 = vsel %vm447_vm7, 0.0, %v445_v9  ;;  %v849_v16 = vsel %vm447_vm7, 1.0, %v1098_v1 }
 0x1ec   :  { %v539_v17 = vmul.f32 0.9, %v450_v15  ;;  %v540_v18 = vmul.f32 0.1, %v454_v13  ;;  %954 = vmatmul.mubr.msk.f32.vlgmr.msra.gmra.mrb[4].mxu0 %vm43_vm0, %v849_v16 }
 0x1ed   :  { %1027 = vmatpush3.bf16.msra.mxu0 %v1152_v5  ;;  %975 = vmatprep.mubr.msk.f32.mxu0 %vm1099_vm1, %v1098_v1 }
 0x1ee   :  { %v541_v19 = vadd.f32 %v540_v18, %v539_v17  ;;  %1028 = vmatprep.subr.bf16.mxu0 %v1097_v0 }
 0x1f0   :  { %vm543_vm8 = vcmp.gt.f32.partialorder %v541_v19, 0.5 }
 0x1f1   :  { %v852_v20 = vsel %vm543_vm8, 1.0, %v1098_v1  ;;  %v546_v21 = vsel %vm543_vm8, 0.0, %v541_v19  ;;  %1030 = vmatpush3.bf16.msra.mxu0 %v1155_v12 }
 0x1f2   :  { %965 = vmatmul.mubr.msk.f32.vlgmr.msra.gmra.mrb[4].mxu1 %vm43_vm0, %v852_v20  ;;  %v635_v38 = vmul.f32 0.9, %v546_v21 }
 0x1f3   :  { %1033 = vmatpush3.bf16.msra.mxu1 %v1152_v5  ;;  %986 = vmatprep.mubr.msk.f32.mxu1 %vm1099_vm1, %v1098_v1 }
 0x1f4   :  { %1034 = vmatprep.subr.bf16.mxu1 %v1097_v0  ;;  %v542_v0 = vmul.f32 0.8, %v454_v13 }
 0x1f7   :  { %1036 = vmatpush3.bf16.msra.mxu1 %v1155_v12  ;;  %v548_v12 = vld [vmem:[#allocation7 + $0x28] sm:$0xff] }
 0x1f8   :  { %v549_v33 = vadd.f32 %v548_v12, %v542_v0 }
 0x256   :  { %v338_v23 = vpop.permute.xlu1 %337 }
 0x257   :  { %v340_v24 = vadd.f32 %v338_v23, %v248_v22 }
 0x259   :  { %v342_v26 = vmul.f32 0.1, %v340_v24  ;;  %v344_v28 = vmul.f32 0.8, %v340_v24 }
 0x25b   :  { %v343_v27 = vadd.f32 %v342_v26, %v341_v25 }
 0x25c   :  { %v434_v29 = vpop.permute.xlu1 %433 }
 0x25d   :  { %845 = vst.msk [vmem:[%s1265_s2 + $0x10] sm:$0xff] %vm47_vm4, %v343_v27  ;;  %v436_v5 = vadd.f32 %v434_v29, %v344_v28  ;;  %v437_v30 = vmul.f32 0.9, %v343_v27 }
 0x25f   :  { %v438_v31 = vmul.f32 0.1, %v436_v5  ;;  %v440_v53 = vmul.f32 0.8, %v436_v5 }
 0x261   :  { %v439_v32 = vadd.f32 %v438_v31, %v437_v30 }
 0x263   :  { %848 = vst.msk [vmem:[%s1265_s2 + $0x18] sm:$0xff] %vm47_vm4, %v439_v32  ;;  %v533_v56 = vmul.f32 0.9, %v439_v32 }
 0x2bf   :  { %v524_v34 = vpop.f32.mrb[4].mxu0 }
 0x2c0   :  { %v550_v35 = vadd.f32 %v549_v33, %v524_v34  ;;  %529 = vrot.lane.b32.xlu0 %v524_v34, %s1100_s1  ;;  %v955_v36 = vpop.f32.mrb[5].mxu0 }
 0x2c2   :  { %v636_v39 = vmul.f32 0.1, %v550_v35  ;;  %v638_v40 = vmul.f32 0.8, %v550_v35 }
 0x2c4   :  { %v637_v41 = vadd.f32 %v636_v39, %v635_v38  ;;  %v645_v42 = vadd.f32 %v644_v37, %v638_v40 }
 0x2c5   :  { %v620_v43 = vpop.f32.mrb[4].mxu1 }
 0x2c6   :  { %vm639_vm9 = vcmp.gt.f32.partialorder %v637_v41, 0.5  ;;  %v646_v44 = vadd.f32 %v645_v42, %v620_v43  ;;  %625 = vrot.lane.b32.xlu1 %v620_v43, %s1100_s1  ;;  %v966_v45 = vpop.f32.mrb[5].mxu1 }
 0x2c7   :  { %v642_v46 = vsel %vm639_vm9, 0.0, %v637_v41  ;;  %v855_v47 = vsel %vm639_vm9, 1.0, %v1098_v1 }
 0x2c8   :  { %v731_v48 = vmul.f32 0.9, %v642_v46  ;;  %v732_v49 = vmul.f32 0.1, %v646_v44  ;;  %976 = vmatmul.mubr.msk.f32.vlgmr.msra.gmra.mrb[6].mxu0 %vm43_vm0, %v855_v47  ;;  %v734_v2 = vmul.f32 0.8, %v646_v44 }
 0x2ca   :  { %v733_v50 = vadd.f32 %v732_v49, %v731_v48  ;;  %v741_v4 = vadd.f32 %v740_v3, %v734_v2 }
 0x2cc   :  { %vm735_vm10 = vcmp.gt.f32.partialorder %v733_v50, 0.5 }
 0x2cd   :  { %v858_v51 = vsel %vm735_vm10, 1.0, %v1098_v1  ;;  %v738_v52 = vsel %vm735_vm10, 0.0, %v733_v50 }
 0x2ce   :  { %987 = vmatmul.mubr.msk.f32.vlgmr.msra.gmra.mrb[6].mxu1 %vm43_vm0, %v858_v51  ;;  %828 = vst.msk [vmem:[#allocation3] sm:$0xff] %vm43_vm0, %v738_v52 }
 0x332   :  { %v530_v54 = vpop.permute.xlu0 %529 }
 0x333   :  { %v532_v55 = vadd.f32 %v530_v54, %v440_v53 }
 0x335   :  { %v534_v57 = vmul.f32 0.1, %v532_v55  ;;  %v536_v59 = vmul.f32 0.8, %v532_v55 }
 0x337   :  { %v535_v58 = vadd.f32 %v534_v57, %v533_v56 }
 0x338   :  { %v626_v60 = vpop.permute.xlu1 %625 }
 0x339   :  { %851 = vst.msk [vmem:[%s1265_s2 + $0x20] sm:$0xff] %vm47_vm4, %v535_v58  ;;  %v628_v61 = vadd.f32 %v626_v60, %v536_v59  ;;  %v629_v1 = vmul.f32 0.9, %v535_v58 }
 0x33b   :  { %v630_v62 = vmul.f32 0.1, %v628_v61  ;;  %v632_v11 = vmul.f32 0.8, %v628_v61 }
 0x33d   :  { %v631_v63 = vadd.f32 %v630_v62, %v629_v1 }
 0x33f   :  { %854 = vst.msk [vmem:[%s1265_s2 + $0x28] sm:$0xff] %vm47_vm4, %v631_v63  ;;  %v725_v15 = vmul.f32 0.9, %v631_v63 }
 0x39b   :  { %v716_v6 = vpop.f32.mrb[6].mxu0 }
 0x39c   :  { %v742_v7 = vadd.f32 %v741_v4, %v716_v6  ;;  %721 = vrot.lane.b32.xlu0 %v716_v6, %s1100_s1  ;;  %v977_v8 = vpop.f32.mrb[7].mxu0 }
 0x39e   :  { %829 = vst.msk [vmem:[#allocation4] sm:$0xff] %vm43_vm0, %v742_v7 }
 0x3a1   :  { %v812_v9 = vpop.f32.mrb[6].mxu1 }
 0x3a2   :  { %827 = vst.msk [vmem:[#allocation2] sm:$0xff] %vm43_vm0, %v812_v9  ;;  %817 = vrot.lane.b32.xlu1 %v812_v9, %s1100_s1  ;;  %v988_v10 = vpop.f32.mrb[7].mxu1 }
 0x40e   :  { %v722_v13 = vpop.permute.xlu0 %721 }
 0x40f   :  { %v724_v14 = vadd.f32 %v722_v13, %v632_v11 }
 0x411   :  { %v726_v16 = vmul.f32 0.1, %v724_v14  ;;  %v728_v18 = vmul.f32 0.8, %v724_v14 }
 0x413   :  { %v727_v17 = vadd.f32 %v726_v16, %v725_v15 }
 0x414   :  { %v818_v19 = vpop.permute.xlu1 %817 }
 0x415   :  { %857 = vst.msk [vmem:[%s1265_s2 + $0x30] sm:$0xff] %vm47_vm4, %v727_v17  ;;  %v820_v20 = vadd.f32 %v818_v19, %v728_v18  ;;  %v821_v21 = vmul.f32 0.9, %v727_v17 }
 0x417   :  { %v822_v22 = vmul.f32 0.1, %v820_v20  ;;  %v824_v23 = vmul.f32 0.8, %v820_v20 }
 0x419   :  { %v823_v24 = vadd.f32 %v822_v22, %v821_v21  ;;  %831 = vst.msk [vmem:[#allocation6] sm:$0xff] %vm47_vm4, %v824_v23 }
 0x41b   :  { %860 = vst.msk [vmem:[%s1265_s2 + $0x38] sm:$0xff] %vm47_vm4, %v823_v24  ;;  %830 = vst.msk [vmem:[#allocation5] sm:$0xff] %vm47_vm4, %v823_v24 }
 0x41c   :  { %836 = vsyncpa [#allocation8], 1 }
 0x41d   :  { %837 = vsyncpa [#allocation10], 1 }

</bundles_post_ra>
